<compile_context>
chip_gen: v7x
topology: tpu7x:2x2x1
jax: 0.10.0
libtpu: 0.0.40
codegen_flags: <defaults>
</compile_context>

<pallas_src>
import numpy as np
import jax
import jax.numpy as jnp
from jax import lax
from jax.experimental import pallas as pl
from jax.experimental.pallas import tpu as pltpu

# ----------------------------- small model config -----------------------------
B = 2                 # batch
C_IN = 3              # in_chans
T, H, W = 4, 16, 16   # frames, height, width
PATCH = 8             # patch_size
TUBELET = 2           # tubelet_size
EMBED = 32            # embed_dim
DEPTH = 2             # depth
HEADS = 4             # num_heads
HEAD_DIM = EMBED // HEADS
HID = int(EMBED * 4.0)          # mlp_ratio = 4.0
NUM_CLASSES = 10
N_PATCH = (T // TUBELET) * (H // PATCH) * (W // PATCH)   # 8 patches
N_TOK = N_PATCH + 1                                      # + cls token
P = C_IN * TUBELET * PATCH * PATCH                       # flattened patch size = 384
LN_EPS = 1e-5                                            # nn.LayerNorm default
SCALE = HEAD_DIM ** (-0.5)                               # qk_scale default

F32 = jnp.float32
BF16 = jnp.bfloat16

# Batched dot_general dimension numbers; the head axis is the leading batch axis.
DN_BMM = (((2,), (1,)), ((0,), (0,)))     # (H, M, K) x (H, K, N) -> (H, M, N)
DN_QKT = (((2,), (2,)), ((0,), (0,)))     # (H, M, K) x (H, N, K) -> (H, M, N)

# NOTE (perf review, v7x): at real VideoMAE sizes (N~1568, D=768) the full (H,N,N) scores and
# full residual will NOT fit VMEM -- switch attention to flash-style q/k block tiling there.
# At these toy shapes everything is VMEM-resident by design.


# ----------------------------- in-kernel math helpers -----------------------------
def _ln_hat(x):
    # Normalization only; the LayerNorm scale/shift are folded into the downstream weight/bias.
    mu = jnp.mean(x, axis=-1, keepdims=True)
    xc = x - mu
    var = jnp.mean(xc * xc, axis=-1, keepdims=True)
    return xc * lax.rsqrt(var + LN_EPS)


def _gelu_tanh(x):
    # tanh-approx GELU: transcendental goes to the (otherwise idle) EUP slot.
    return 0.5 * x * (1.0 + jnp.tanh(0.7978845608028654 * (x + 0.044715 * x * x * x)))


# ----------------------------- fused Pallas kernel -----------------------------
def fused_vit_kernel(patch_ref, convw_ref, init_ref, hmask_ref,
                     wqkv_ref, qkvb_ref, projw_ref, projb_ref,
                     f1w_ref, f1b_ref, f2w_ref, f2b_ref,
                     headw_ref, headb_ref, o_ref):
    # ---- patch embedding (Conv3d-as-matmul) + cls token + conv-bias + positional embedding ----
    x = jnp.dot(patch_ref[0], convw_ref[...], preferred_element_type=F32) + init_ref[...]

    # One-hot per-head mask over the embedding lanes, hoisted out of the block loop.
    hmask = hmask_ref[...]                                                 # (HEADS, 1, EMBED) bf16

    def block_body(d, x):
        # ------------------------------- attention branch -------------------------------
        ln1 = _ln_hat(x).astype(BF16)                                      # (N, D); ln1 w/b folded
        qkv = jnp.dot(ln1, wqkv_ref[d],
                      preferred_element_type=F32) + qkvb_ref[d]            # (N, 3D), one MXU push
        q = qkv[:, :EMBED].astype(BF16)                                    # qk scale already folded
        k = qkv[:, EMBED:2 * EMBED].astype(BF16)
        v = qkv[:, 2 * EMBED:].astype(BF16)

        # Per-head attention via one-hot head masks (no lane<->sublane reshapes needed):
        #   s[h] = (q * mask_h) @ k^T  == q_h @ k_h^T   (masked contraction over all D lanes)
        qh = jnp.broadcast_to(q, (HEADS, N_TOK, EMBED)) * hmask
        kh = jnp.broadcast_to(k, (HEADS, N_TOK, EMBED))
        s = lax.dot_general(qh, kh, DN_QKT, preferred_element_type=F32)    # (H, N, N)
        s = s - jnp.max(s, axis=-1, keepdims=True)
        pexp = jnp.exp(s)
        attn = pexp * pl.reciprocal(jnp.sum(pexp, axis=-1, keepdims=True), approx=True)

        #   ao[h] = attn_h @ (v * mask_h) -> nonzero only in head-h lanes; sum over h = head-merge.
        vh = jnp.broadcast_to(v, (HEADS, N_TOK, EMBED)) * hmask
        ao = lax.dot_general(attn.astype(BF16), vh, DN_BMM,
                             preferred_element_type=F32)                   # (H, N, D)
        amerged = jnp.sum(ao, axis=0).astype(BF16)                         # (N, D), head-major
        x = x + jnp.dot(amerged, projw_ref[d],
                        preferred_element_type=F32) + projb_ref[d]         # single 2-D proj matmul

        # ------------------------------- MLP branch -------------------------------
        ln2 = _ln_hat(x).astype(BF16)                                      # ln2 w/b folded into fc1
        h = jnp.dot(ln2, f1w_ref[d], preferred_element_type=F32) + f1b_ref[d]
        h = _gelu_tanh(h)
        x = x + jnp.dot(h.astype(BF16), f2w_ref[d],
                        preferred_element_type=F32) + f2b_ref[d]
        return x

    # DEPTH collapsed into an in-kernel loop; residual stream stays a VMEM-resident value.
    x = lax.fori_loop(0, DEPTH, block_body, x, unroll=True)

    # ---- mean-pool over tokens -> fc_norm (folded into head weights) -> classifier ----
    xm = jnp.sum(x, axis=0, keepdims=True) * (1.0 / N_TOK)                 # (1, D)
    xm = _ln_hat(xm).astype(BF16)
    o_ref[0] = jnp.dot(xm, headw_ref[...],
                       preferred_element_type=F32) + headb_ref[...]


# ----------------------------- pallas_call wrapper -----------------------------
def _whole_spec(shape):
    # Grid-invariant operand: whole array resident in VMEM, loaded once for the entire grid.
    n = len(shape)
    return pl.BlockSpec(tuple(shape), lambda b: (0,) * n)


def run_fused_vit(patches, ops):
    in_specs = [pl.BlockSpec((1, N_TOK, P), lambda b: (b, 0, 0))]          # per-batch patch block
    in_specs += [_whole_spec(o.shape) for o in ops]                        # weights, whole & stacked
    out = pl.pallas_call(
        fused_vit_kernel,
        out_shape=jax.ShapeDtypeStruct((B, 1, NUM_CLASSES), jnp.float32),
        grid_spec=pltpu.PrefetchScalarGridSpec(
            num_scalar_prefetch=0,
            grid=(B,),                                                     # batch only; DEPTH in-kernel
            in_specs=in_specs,
            out_specs=pl.BlockSpec((1, 1, NUM_CLASSES), lambda b: (b, 0, 0)),
        ),
        compiler_params=pltpu.CompilerParams(
            dimension_semantics=("parallel",)),                            # v7x: 2 TCs split the batch
    )(patches, *ops)
    return out[:, 0, :]


# ----------------------------- glue (plain JAX) -----------------------------
def extract_patches(x):
    # x: (B, C, T, H, W) NCTHW -> (B, N_TOK, P), bf16.  Token 0 is a zero row (cls slot); patch
    # feature order is (C, kt, kh, kw), token order is t-major, h, w -- exactly like
    # `conv(x).flatten(2).transpose(1, 2)` in the reference module.
    xb = x.reshape(B, C_IN, T // TUBELET, TUBELET, H // PATCH, PATCH, W // PATCH, PATCH)
    xb = xb.transpose(0, 2, 4, 6, 1, 3, 5, 7).reshape(B, N_PATCH, P)
    xb = jnp.concatenate([jnp.zeros((B, 1, P), xb.dtype), xb], axis=1)
    return xb.astype(BF16)                                                 # halve the patch DMA


def sinusoid_table(n_position, d_hid):
    pos = np.arange(n_position, dtype=np.float64)[:, None]
    hid = np.arange(d_hid)[None, :]
    angle = pos / np.power(10000.0, 2 * (hid // 2) / d_hid)
    table = np.zeros_like(angle)
    table[:, 0::2] = np.sin(angle[:, 0::2])
    table[:, 1::2] = np.cos(angle[:, 1::2])
    return jnp.asarray(table[None, ...], dtype=jnp.float32)   # (1, n, d)


def init_params(key):
    keys = iter(jax.random.split(key, 8 + DEPTH * 8))

    def nrm(shape, std=0.02):
        return jax.random.normal(next(keys), shape, jnp.float32) * std

    params = {
        "conv_w": nrm((EMBED, C_IN, TUBELET, PATCH, PATCH)),   # Conv3d weight (out, in, kt, kh, kw)
        "conv_b": nrm((EMBED,)),
        "cls_token": nrm((1, 1, EMBED)),
        "pos_embed": sinusoid_table(N_TOK, EMBED),             # fixed sinusoid (non-learnable)
        "fc_norm_w": jnp.ones((EMBED,), jnp.float32),
        "fc_norm_b": jnp.zeros((EMBED,), jnp.float32),
        # NOTE: reference uses init_scale=0.0 which zeroes the head; keep a non-trivial head.
        "head_w": nrm((NUM_CLASSES, EMBED)),
        "head_b": nrm((NUM_CLASSES,)),
        "blocks": [],
    }
    for _ in range(DEPTH):
        params["blocks"].append({
            "ln1_w": jnp.ones((EMBED,), jnp.float32),
            "ln1_b": jnp.zeros((EMBED,), jnp.float32),
            "qkv_w": nrm((3 * EMBED, EMBED)),                  # qkv_bias=False
            "proj_w": nrm((EMBED, EMBED)),
            "proj_b": nrm((EMBED,)),
            "ln2_w": jnp.ones((EMBED,), jnp.float32),
            "ln2_b": jnp.zeros((EMBED,), jnp.float32),
            "fc1_w": nrm((HID, EMBED)),
            "fc1_b": nrm((HID,)),
            "fc2_w": nrm((EMBED, HID)),
            "fc2_b": nrm((EMBED,)),
        })
    return params


def pack_operands(params):
    # Repack torch-layout weights into the kernel layouts (done once, outside the hot path):
    #   * q/k/v fused into one (DEPTH, D, 3D) weight; qk scale folded into the q columns and the
    #     ln1 scale/shift folded into the weight/bias,
    #   * proj as a plain (D, D) matrix (rows head-major, matching the merged attention output),
    #   * ln2 folded into fc1, fc_norm folded into the classifier head,
    #   * matmul operand weights cast to bf16; biases stay f32,
    #   * all per-block operands stacked on a leading DEPTH axis (indexed in-kernel by ref[d]).
    pos = params["pos_embed"][0]                                       # (N_TOK, D)
    conv_wt = params["conv_w"].reshape(EMBED, P).T.astype(BF16)        # (P, D)
    init_bias = jnp.concatenate(
        [params["cls_token"][0] + pos[:1],                             # cls token + pos[0]
         params["conv_b"][None, :] + pos[1:]], axis=0)                 # conv bias + pos[1:]

    head_ids = np.arange(EMBED) // HEAD_DIM
    hmask = (head_ids[None, None, :] == np.arange(HEADS)[:, None, None]).astype(np.float32)
    hmask = jnp.asarray(hmask, BF16)                                   # (HEADS, 1, EMBED) one-hot

    qk_scale_cols = jnp.concatenate(
        [jnp.full((EMBED,), SCALE, jnp.float32), jnp.ones((2 * EMBED,), jnp.float32)])[None, :]

    wqkv, qkvb, projw, projb, f1w, f1b, f2w, f2b = [], [], [], [], [], [], [], []
    for blk in params["blocks"]:
        wt = blk["qkv_w"].T * qk_scale_cols                            # (D, 3D), scale in q cols
        wqkv.append(blk["ln1_w"][:, None] * wt)                        # fold ln1 scale into rows
        qkvb.append((blk["ln1_b"] @ wt)[None, :])                      # fold ln1 shift (no qkv bias)
        projw.append(blk["proj_w"].T)                                  # (all_head_dim, D)
        projb.append(blk["proj_b"][None, :])
        f1t = blk["fc1_w"].T                                           # (D, HID)
        f1w.append(blk["ln2_w"][:, None] * f1t)                        # fold ln2 scale
        f1b.append((blk["fc1_b"] + blk["ln2_b"] @ f1t)[None, :])       # fold ln2 shift
        f2w.append(blk["fc2_w"].T)                                     # (HID, D)
        f2b.append(blk["fc2_b"][None, :])

    headwt = params["head_w"].T                                        # (D, C)
    headw = (params["fc_norm_w"][:, None] * headwt).astype(BF16)       # fold fc_norm scale
    headb = (params["head_b"] + params["fc_norm_b"] @ headwt)[None, :] # fold fc_norm shift

    st = lambda xs, dt=F32: jnp.stack(xs).astype(dt)
    return (conv_wt, init_bias, hmask,
            st(wqkv, BF16), st(qkvb), st(projw, BF16), st(projb),
            st(f1w, BF16), st(f1b), st(f2w, BF16), st(f2b),
            headw, headb)


@jax.jit
def vit_forward(x, ops):
    return run_fused_vit(extract_patches(x), ops)


# ----------------------------- pure-JAX reference (for self-check) -----------------------------
def _ref_ln(x, w, b):
    mu = jnp.mean(x, axis=-1, keepdims=True)
    var = jnp.mean((x - mu) ** 2, axis=-1, keepdims=True)
    return (x - mu) / jnp.sqrt(var + LN_EPS) * w + b


def reference_forward(x, params):
    xb = x.reshape(B, C_IN, T // TUBELET, TUBELET, H // PATCH, PATCH, W // PATCH, PATCH)
    xb = xb.transpose(0, 2, 4, 6, 1, 3, 5, 7).reshape(B, N_PATCH, P)
    tok = xb @ params["conv_w"].reshape(EMBED, P).T + params["conv_b"]
    cls = jnp.broadcast_to(params["cls_token"], (B, 1, EMBED))
    x = jnp.concatenate([cls, tok], axis=1) + params["pos_embed"]
    for blk in params["blocks"]:
        h = _ref_ln(x, blk["ln1_w"], blk["ln1_b"])
        qkv = h @ blk["qkv_w"].T                                   # (B, N, 3D)
        qkv = qkv.reshape(B, N_TOK, 3, HEADS, HEAD_DIM).transpose(2, 0, 3, 1, 4)
        q, k, v = qkv[0] * SCALE, qkv[1], qkv[2]
        attn = jax.nn.softmax(jnp.einsum("bhqd,bhkd->bhqk", q, k), axis=-1)
        a = jnp.einsum("bhqk,bhkd->bhqd", attn, v).transpose(0, 2, 1, 3).reshape(B, N_TOK, EMBED)
        x = x + (a @ blk["proj_w"].T + blk["proj_b"])
        h2 = _ref_ln(x, blk["ln2_w"], blk["ln2_b"])
        h2 = jax.nn.gelu(h2 @ blk["fc1_w"].T + blk["fc1_b"], approximate=False)
        x = x + (h2 @ blk["fc2_w"].T + blk["fc2_b"])
    xm = _ref_ln(jnp.mean(x, axis=1), params["fc_norm_w"], params["fc_norm_b"])
    return xm @ params["head_w"].T + params["head_b"]


# ----------------------------- main -----------------------------
if __name__ == "__main__":
    key = jax.random.PRNGKey(0)
    pkey, xkey = jax.random.split(key)
    params = init_params(pkey)
    ops = pack_operands(params)
    x = jax.random.normal(xkey, (B, C_IN, T, H, W), jnp.float32)   # NCTHW like PyTorch

    out = vit_forward(x, ops)
    out = jax.block_until_ready(out)

    ref = reference_forward(x, params)
    np.testing.assert_allclose(np.asarray(out), np.asarray(ref), rtol=1e-2, atol=1e-2)
    print("KERNEL_OK")
</pallas_src>

<mosaic_0001>
module attributes {stable_mosaic.version = 11 : i64} {
  func.func @fused_vit_kernel(%arg0: i32, %arg1: memref<1x9x384xbf16, #tpu.memory_space<vmem>>, %arg2: memref<384x32xbf16, #tpu.memory_space<vmem>>, %arg3: memref<9x32xf32, #tpu.memory_space<vmem>>, %arg4: memref<4x1x32xbf16, #tpu.memory_space<vmem>>, %arg5: memref<2x32x96xbf16, #tpu.memory_space<vmem>>, %arg6: memref<2x1x96xf32, #tpu.memory_space<vmem>>, %arg7: memref<2x32x32xbf16, #tpu.memory_space<vmem>>, %arg8: memref<2x1x32xf32, #tpu.memory_space<vmem>>, %arg9: memref<2x32x128xbf16, #tpu.memory_space<vmem>>, %arg10: memref<2x1x128xf32, #tpu.memory_space<vmem>>, %arg11: memref<2x128x32xbf16, #tpu.memory_space<vmem>>, %arg12: memref<2x1x32xf32, #tpu.memory_space<vmem>>, %arg13: memref<32x10xbf16, #tpu.memory_space<vmem>>, %arg14: memref<1x10xf32, #tpu.memory_space<vmem>>, %arg15: memref<1x1x10xf32, #tpu.memory_space<vmem>>) attributes {dimension_semantics = [#tpu.dimension_semantics<parallel>], iteration_bounds = array<i64: 2>, scalar_prefetch = 0 : i64, scratch_operands = 0 : i64, tpu.core_type = #tpu.core_type<tc>, window_params = [{transform_indices = @transform_0, window_bounds = array<i64: 1, 9, 384>}, {pipeline_mode = #tpu.pipeline_mode<synchronous>, transform_indices = @transform_1, window_bounds = array<i64: 384, 32>}, {pipeline_mode = #tpu.pipeline_mode<synchronous>, transform_indices = @transform_2, window_bounds = array<i64: 9, 32>}, {pipeline_mode = #tpu.pipeline_mode<synchronous>, transform_indices = @transform_3, window_bounds = array<i64: 4, 1, 32>}, {pipeline_mode = #tpu.pipeline_mode<synchronous>, transform_indices = @transform_4, window_bounds = array<i64: 2, 32, 96>}, {pipeline_mode = #tpu.pipeline_mode<synchronous>, transform_indices = @transform_5, window_bounds = array<i64: 2, 1, 96>}, {pipeline_mode = #tpu.pipeline_mode<synchronous>, transform_indices = @transform_6, window_bounds = array<i64: 2, 32, 32>}, {pipeline_mode = #tpu.pipeline_mode<synchronous>, transform_indices = @transform_7, window_bounds = array<i64: 2, 1, 32>}, {pipeline_mode = #tpu.pipeline_mode<synchronous>, transform_indices = @transform_8, window_bounds = array<i64: 2, 32, 128>}, {pipeline_mode = #tpu.pipeline_mode<synchronous>, transform_indices = @transform_9, window_bounds = array<i64: 2, 1, 128>}, {pipeline_mode = #tpu.pipeline_mode<synchronous>, transform_indices = @transform_10, window_bounds = array<i64: 2, 128, 32>}, {pipeline_mode = #tpu.pipeline_mode<synchronous>, transform_indices = @transform_11, window_bounds = array<i64: 2, 1, 32>}, {pipeline_mode = #tpu.pipeline_mode<synchronous>, transform_indices = @transform_12, window_bounds = array<i64: 32, 10>}, {pipeline_mode = #tpu.pipeline_mode<synchronous>, transform_indices = @transform_13, window_bounds = array<i64: 1, 10>}, {transform_indices = @transform_14, window_bounds = array<i64: 1, 1, 10>}]} {
    %c0 = arith.constant 0 : index
    %c0_0 = arith.constant 0 : index
    %c0_1 = arith.constant 0 : index
    %0 = vector.load %arg1[%c0, %c0_0, %c0_1] : memref<1x9x384xbf16, #tpu.memory_space<vmem>>, vector<1x9x384xbf16>
    %1 = vector.shape_cast %0 : vector<1x9x384xbf16> to vector<9x384xbf16>
    %c0_2 = arith.constant 0 : index
    %c0_3 = arith.constant 0 : index
    %2 = vector.load %arg2[%c0_2, %c0_3] : memref<384x32xbf16, #tpu.memory_space<vmem>>, vector<384x32xbf16>
    %cst = arith.constant dense<0.000000e+00> : vector<9x32xf32>
    %3 = tpu.matmul %1, %2, %cst {dimension_numbers = #tpu.dot_dimension_numbers<[1], [0], [0], [1], [0, 0, 1, 1], [], []>} : vector<9x384xbf16>, vector<384x32xbf16>, vector<9x32xf32> -> vector<9x32xf32>
    %c0_4 = arith.constant 0 : index
    %c0_5 = arith.constant 0 : index
    %4 = vector.load %arg3[%c0_4, %c0_5] : memref<9x32xf32, #tpu.memory_space<vmem>>, vector<9x32xf32>
    %5 = arith.addf %3, %4 : vector<9x32xf32>
    %c0_6 = arith.constant 0 : index
    %c0_7 = arith.constant 0 : index
    %c0_8 = arith.constant 0 : index
    %6 = vector.load %arg4[%c0_6, %c0_7, %c0_8] : memref<4x1x32xbf16, #tpu.memory_space<vmem>>, vector<4x1x32xbf16>
    %c0_i32 = arith.constant 0 : i32
    %cst_9 = arith.constant dense<0.000000e+00> : vector<9xf32>
    %7 = vector.multi_reduction <add>, %5, %cst_9 [1] : vector<9x32xf32> to vector<9xf32>
    %8 = vector.shape_cast %7 : vector<9xf32> to vector<9x1xf32>
    %cst_10 = arith.constant 3.200000e+01 : f32
    %9 = vector.broadcast %cst_10 : f32 to vector<9x1xf32>
    %10 = arith.divf %8, %9 : vector<9x1xf32>
    %11 = vector.broadcast %10 : vector<9x1xf32> to vector<9x32xf32>
    %12 = arith.subf %5, %11 : vector<9x32xf32>
    %13 = arith.mulf %12, %12 : vector<9x32xf32>
    %cst_11 = arith.constant dense<0.000000e+00> : vector<9xf32>
    %14 = vector.multi_reduction <add>, %13, %cst_11 [1] : vector<9x32xf32> to vector<9xf32>
    %15 = vector.shape_cast %14 : vector<9xf32> to vector<9x1xf32>
    %cst_12 = arith.constant 3.200000e+01 : f32
    %16 = vector.broadcast %cst_12 : f32 to vector<9x1xf32>
    %17 = arith.divf %15, %16 : vector<9x1xf32>
    %cst_13 = arith.constant 9.99999974E-6 : f32
    %18 = vector.broadcast %cst_13 : f32 to vector<9x1xf32>
    %19 = arith.addf %17, %18 : vector<9x1xf32>
    %20 = math.rsqrt %19 : vector<9x1xf32>
    %21 = vector.broadcast %20 : vector<9x1xf32> to vector<9x32xf32>
    %22 = arith.mulf %12, %21 : vector<9x32xf32>
    %23 = arith.truncf %22 : vector<9x32xf32> to vector<9x32xbf16>
    %24 = arith.index_cast %c0_i32 : i32 to index
    %c0_14 = arith.constant 0 : index
    %c0_15 = arith.constant 0 : index
    %25 = vector.load %arg5[%24, %c0_14, %c0_15] : memref<2x32x96xbf16, #tpu.memory_space<vmem>>, vector<1x32x96xbf16>
    %26 = vector.shape_cast %25 : vector<1x32x96xbf16> to vector<32x96xbf16>
    %cst_16 = arith.constant dense<0.000000e+00> : vector<9x96xf32>
    %27 = tpu.matmul %23, %26, %cst_16 {dimension_numbers = #tpu.dot_dimension_numbers<[1], [0], [0], [1], [0, 0, 1, 1], [], []>} : vector<9x32xbf16>, vector<32x96xbf16>, vector<9x96xf32> -> vector<9x96xf32>
    %28 = arith.index_cast %c0_i32 : i32 to index
    %c0_17 = arith.constant 0 : index
    %c0_18 = arith.constant 0 : index
    %29 = vector.load %arg6[%28, %c0_17, %c0_18] : memref<2x1x96xf32, #tpu.memory_space<vmem>>, vector<1x1x96xf32>
    %30 = vector.shape_cast %29 : vector<1x1x96xf32> to vector<1x96xf32>
    %31 = vector.broadcast %30 : vector<1x96xf32> to vector<9x96xf32>
    %32 = arith.addf %27, %31 : vector<9x96xf32>
    %33 = vector.extract_strided_slice %32 {offsets = [0, 0], sizes = [9, 32], strides = [1, 1]} : vector<9x96xf32> to vector<9x32xf32>
    %34 = arith.truncf %33 : vector<9x32xf32> to vector<9x32xbf16>
    %35 = vector.extract_strided_slice %32 {offsets = [0, 32], sizes = [9, 32], strides = [1, 1]} : vector<9x96xf32> to vector<9x32xf32>
    %36 = arith.truncf %35 : vector<9x32xf32> to vector<9x32xbf16>
    %37 = vector.extract_strided_slice %32 {offsets = [0, 64], sizes = [9, 32], strides = [1, 1]} : vector<9x96xf32> to vector<9x32xf32>
    %38 = arith.truncf %37 : vector<9x32xf32> to vector<9x32xbf16>
    %39 = vector.shape_cast %34 : vector<9x32xbf16> to vector<1x9x32xbf16>
    %40 = vector.broadcast %39 : vector<1x9x32xbf16> to vector<4x9x32xbf16>
    %41 = vector.broadcast %6 : vector<4x1x32xbf16> to vector<4x9x32xbf16>
    %42 = arith.mulf %40, %41 : vector<4x9x32xbf16>
    %43 = vector.shape_cast %36 : vector<9x32xbf16> to vector<1x9x32xbf16>
    %44 = vector.broadcast %43 : vector<1x9x32xbf16> to vector<4x9x32xbf16>
    %cst_19 = arith.constant dense<0.000000e+00> : vector<4x9x9xf32>
    %45 = tpu.matmul %42, %44, %cst_19 {dimension_numbers = #tpu.dot_dimension_numbers<[2], [2], [1], [1], [0, 0, 0, 1, 1, 1], [0], [0]>} : vector<4x9x32xbf16>, vector<4x9x32xbf16>, vector<4x9x9xf32> -> vector<4x9x9xf32>
    %cst_20 = arith.constant dense<0xFF800000> : vector<4x9xf32>
    %46 = vector.multi_reduction <maximumf>, %45, %cst_20 [2] : vector<4x9x9xf32> to vector<4x9xf32>
    %47 = vector.shape_cast %46 : vector<4x9xf32> to vector<4x9x1xf32>
    %48 = vector.broadcast %47 : vector<4x9x1xf32> to vector<4x9x9xf32>
    %49 = arith.subf %45, %48 : vector<4x9x9xf32>
    %50 = math.exp %49 : vector<4x9x9xf32>
    %cst_21 = arith.constant dense<0.000000e+00> : vector<4x9xf32>
    %51 = vector.multi_reduction <add>, %50, %cst_21 [2] : vector<4x9x9xf32> to vector<4x9xf32>
    %52 = vector.shape_cast %51 : vector<4x9xf32> to vector<4x9x1xf32>
    %53 = tpu.reciprocal %52 {approx = true} : vector<4x9x1xf32> -> vector<4x9x1xf32>
    %54 = vector.broadcast %53 : vector<4x9x1xf32> to vector<4x9x9xf32>
    %55 = arith.mulf %50, %54 : vector<4x9x9xf32>
    %56 = vector.shape_cast %38 : vector<9x32xbf16> to vector<1x9x32xbf16>
    %57 = vector.broadcast %56 : vector<1x9x32xbf16> to vector<4x9x32xbf16>
    %58 = vector.broadcast %6 : vector<4x1x32xbf16> to vector<4x9x32xbf16>
    %59 = arith.mulf %57, %58 : vector<4x9x32xbf16>
    %60 = arith.truncf %55 : vector<4x9x9xf32> to vector<4x9x9xbf16>
    %cst_22 = arith.constant dense<0.000000e+00> : vector<4x9x32xf32>
    %61 = tpu.matmul %60, %59, %cst_22 {dimension_numbers = #tpu.dot_dimension_numbers<[2], [1], [1], [2], [0, 0, 0, 1, 1, 2], [0], [0]>} : vector<4x9x9xbf16>, vector<4x9x32xbf16>, vector<4x9x32xf32> -> vector<4x9x32xf32>
    %cst_23 = arith.constant dense<0.000000e+00> : vector<9x32xf32>
    %62 = vector.multi_reduction <add>, %61, %cst_23 [0] : vector<4x9x32xf32> to vector<9x32xf32>
    %63 = arith.truncf %62 : vector<9x32xf32> to vector<9x32xbf16>
    %64 = arith.index_cast %c0_i32 : i32 to index
    %c0_24 = arith.constant 0 : index
    %c0_25 = arith.constant 0 : index
    %65 = vector.load %arg7[%64, %c0_24, %c0_25] : memref<2x32x32xbf16, #tpu.memory_space<vmem>>, vector<1x32x32xbf16>
    %66 = vector.shape_cast %65 : vector<1x32x32xbf16> to vector<32x32xbf16>
    %cst_26 = arith.constant dense<0.000000e+00> : vector<9x32xf32>
    %67 = tpu.matmul %63, %66, %cst_26 {dimension_numbers = #tpu.dot_dimension_numbers<[1], [0], [0], [1], [0, 0, 1, 1], [], []>} : vector<9x32xbf16>, vector<32x32xbf16>, vector<9x32xf32> -> vector<9x32xf32>
    %68 = arith.addf %5, %67 : vector<9x32xf32>
    %69 = arith.index_cast %c0_i32 : i32 to index
    %c0_27 = arith.constant 0 : index
    %c0_28 = arith.constant 0 : index
    %70 = vector.load %arg8[%69, %c0_27, %c0_28] : memref<2x1x32xf32, #tpu.memory_space<vmem>>, vector<1x1x32xf32>
    %71 = vector.shape_cast %70 : vector<1x1x32xf32> to vector<1x32xf32>
    %72 = vector.broadcast %71 : vector<1x32xf32> to vector<9x32xf32>
    %73 = arith.addf %68, %72 : vector<9x32xf32>
    %cst_29 = arith.constant dense<0.000000e+00> : vector<9xf32>
    %74 = vector.multi_reduction <add>, %73, %cst_29 [1] : vector<9x32xf32> to vector<9xf32>
    %75 = vector.shape_cast %74 : vector<9xf32> to vector<9x1xf32>
    %cst_30 = arith.constant 3.200000e+01 : f32
    %76 = vector.broadcast %cst_30 : f32 to vector<9x1xf32>
    %77 = arith.divf %75, %76 : vector<9x1xf32>
    %78 = vector.broadcast %77 : vector<9x1xf32> to vector<9x32xf32>
    %79 = arith.subf %73, %78 : vector<9x32xf32>
    %80 = arith.mulf %79, %79 : vector<9x32xf32>
    %cst_31 = arith.constant dense<0.000000e+00> : vector<9xf32>
    %81 = vector.multi_reduction <add>, %80, %cst_31 [1] : vector<9x32xf32> to vector<9xf32>
    %82 = vector.shape_cast %81 : vector<9xf32> to vector<9x1xf32>
    %cst_32 = arith.constant 3.200000e+01 : f32
    %83 = vector.broadcast %cst_32 : f32 to vector<9x1xf32>
    %84 = arith.divf %82, %83 : vector<9x1xf32>
    %cst_33 = arith.constant 9.99999974E-6 : f32
    %85 = vector.broadcast %cst_33 : f32 to vector<9x1xf32>
    %86 = arith.addf %84, %85 : vector<9x1xf32>
    %87 = math.rsqrt %86 : vector<9x1xf32>
    %88 = vector.broadcast %87 : vector<9x1xf32> to vector<9x32xf32>
    %89 = arith.mulf %79, %88 : vector<9x32xf32>
    %90 = arith.truncf %89 : vector<9x32xf32> to vector<9x32xbf16>
    %91 = arith.index_cast %c0_i32 : i32 to index
    %c0_34 = arith.constant 0 : index
    %c0_35 = arith.constant 0 : index
    %92 = vector.load %arg9[%91, %c0_34, %c0_35] : memref<2x32x128xbf16, #tpu.memory_space<vmem>>, vector<1x32x128xbf16>
    %93 = vector.shape_cast %92 : vector<1x32x128xbf16> to vector<32x128xbf16>
    %cst_36 = arith.constant dense<0.000000e+00> : vector<9x128xf32>
    %94 = tpu.matmul %90, %93, %cst_36 {dimension_numbers = #tpu.dot_dimension_numbers<[1], [0], [0], [1], [0, 0, 1, 1], [], []>} : vector<9x32xbf16>, vector<32x128xbf16>, vector<9x128xf32> -> vector<9x128xf32>
    %95 = arith.index_cast %c0_i32 : i32 to index
    %c0_37 = arith.constant 0 : index
    %c0_38 = arith.constant 0 : index
    %96 = vector.load %arg10[%95, %c0_37, %c0_38] : memref<2x1x128xf32, #tpu.memory_space<vmem>>, vector<1x1x128xf32>
    %97 = vector.shape_cast %96 : vector<1x1x128xf32> to vector<1x128xf32>
    %98 = vector.broadcast %97 : vector<1x128xf32> to vector<9x128xf32>
    %99 = arith.addf %94, %98 : vector<9x128xf32>
    %cst_39 = arith.constant 5.000000e-01 : f32
    %100 = vector.broadcast %cst_39 : f32 to vector<9x128xf32>
    %101 = arith.mulf %100, %99 : vector<9x128xf32>
    %cst_40 = arith.constant 4.471500e-02 : f32
    %102 = vector.broadcast %cst_40 : f32 to vector<9x128xf32>
    %103 = arith.mulf %102, %99 : vector<9x128xf32>
    %104 = arith.mulf %103, %99 : vector<9x128xf32>
    %105 = arith.mulf %104, %99 : vector<9x128xf32>
    %106 = arith.addf %99, %105 : vector<9x128xf32>
    %cst_41 = arith.constant 0.797884583 : f32
    %107 = vector.broadcast %cst_41 : f32 to vector<9x128xf32>
    %108 = arith.mulf %107, %106 : vector<9x128xf32>
    %109 = math.tanh %108 : vector<9x128xf32>
    %cst_42 = arith.constant 1.000000e+00 : f32
    %110 = vector.broadcast %cst_42 : f32 to vector<9x128xf32>
    %111 = arith.addf %110, %109 : vector<9x128xf32>
    %112 = arith.mulf %101, %111 : vector<9x128xf32>
    %113 = arith.truncf %112 : vector<9x128xf32> to vector<9x128xbf16>
    %114 = arith.index_cast %c0_i32 : i32 to index
    %c0_43 = arith.constant 0 : index
    %c0_44 = arith.constant 0 : index
    %115 = vector.load %arg11[%114, %c0_43, %c0_44] : memref<2x128x32xbf16, #tpu.memory_space<vmem>>, vector<1x128x32xbf16>
    %116 = vector.shape_cast %115 : vector<1x128x32xbf16> to vector<128x32xbf16>
    %cst_45 = arith.constant dense<0.000000e+00> : vector<9x32xf32>
    %117 = tpu.matmul %113, %116, %cst_45 {dimension_numbers = #tpu.dot_dimension_numbers<[1], [0], [0], [1], [0, 0, 1, 1], [], []>} : vector<9x128xbf16>, vector<128x32xbf16>, vector<9x32xf32> -> vector<9x32xf32>
    %118 = arith.addf %73, %117 : vector<9x32xf32>
    %119 = arith.index_cast %c0_i32 : i32 to index
    %c0_46 = arith.constant 0 : index
    %c0_47 = arith.constant 0 : index
    %120 = vector.load %arg12[%119, %c0_46, %c0_47] : memref<2x1x32xf32, #tpu.memory_space<vmem>>, vector<1x1x32xf32>
    %121 = vector.shape_cast %120 : vector<1x1x32xf32> to vector<1x32xf32>
    %122 = vector.broadcast %121 : vector<1x32xf32> to vector<9x32xf32>
    %123 = arith.addf %118, %122 : vector<9x32xf32>
    %c1_i32 = arith.constant 1 : i32
    %cst_48 = arith.constant dense<0.000000e+00> : vector<9xf32>
    %124 = vector.multi_reduction <add>, %123, %cst_48 [1] : vector<9x32xf32> to vector<9xf32>
    %125 = vector.shape_cast %124 : vector<9xf32> to vector<9x1xf32>
    %cst_49 = arith.constant 3.200000e+01 : f32
    %126 = vector.broadcast %cst_49 : f32 to vector<9x1xf32>
    %127 = arith.divf %125, %126 : vector<9x1xf32>
    %128 = vector.broadcast %127 : vector<9x1xf32> to vector<9x32xf32>
    %129 = arith.subf %123, %128 : vector<9x32xf32>
    %130 = arith.mulf %129, %129 : vector<9x32xf32>
    %cst_50 = arith.constant dense<0.000000e+00> : vector<9xf32>
    %131 = vector.multi_reduction <add>, %130, %cst_50 [1] : vector<9x32xf32> to vector<9xf32>
    %132 = vector.shape_cast %131 : vector<9xf32> to vector<9x1xf32>
    %cst_51 = arith.constant 3.200000e+01 : f32
    %133 = vector.broadcast %cst_51 : f32 to vector<9x1xf32>
    %134 = arith.divf %132, %133 : vector<9x1xf32>
    %cst_52 = arith.constant 9.99999974E-6 : f32
    %135 = vector.broadcast %cst_52 : f32 to vector<9x1xf32>
    %136 = arith.addf %134, %135 : vector<9x1xf32>
    %137 = math.rsqrt %136 : vector<9x1xf32>
    %138 = vector.broadcast %137 : vector<9x1xf32> to vector<9x32xf32>
    %139 = arith.mulf %129, %138 : vector<9x32xf32>
    %140 = arith.truncf %139 : vector<9x32xf32> to vector<9x32xbf16>
    %141 = arith.index_cast %c1_i32 : i32 to index
    %c0_53 = arith.constant 0 : index
    %c0_54 = arith.constant 0 : index
    %142 = vector.load %arg5[%141, %c0_53, %c0_54] : memref<2x32x96xbf16, #tpu.memory_space<vmem>>, vector<1x32x96xbf16>
    %143 = vector.shape_cast %142 : vector<1x32x96xbf16> to vector<32x96xbf16>
    %cst_55 = arith.constant dense<0.000000e+00> : vector<9x96xf32>
    %144 = tpu.matmul %140, %143, %cst_55 {dimension_numbers = #tpu.dot_dimension_numbers<[1], [0], [0], [1], [0, 0, 1, 1], [], []>} : vector<9x32xbf16>, vector<32x96xbf16>, vector<9x96xf32> -> vector<9x96xf32>
    %145 = arith.index_cast %c1_i32 : i32 to index
    %c0_56 = arith.constant 0 : index
    %c0_57 = arith.constant 0 : index
    %146 = vector.load %arg6[%145, %c0_56, %c0_57] : memref<2x1x96xf32, #tpu.memory_space<vmem>>, vector<1x1x96xf32>
    %147 = vector.shape_cast %146 : vector<1x1x96xf32> to vector<1x96xf32>
    %148 = vector.broadcast %147 : vector<1x96xf32> to vector<9x96xf32>
    %149 = arith.addf %144, %148 : vector<9x96xf32>
    %150 = vector.extract_strided_slice %149 {offsets = [0, 0], sizes = [9, 32], strides = [1, 1]} : vector<9x96xf32> to vector<9x32xf32>
    %151 = arith.truncf %150 : vector<9x32xf32> to vector<9x32xbf16>
    %152 = vector.extract_strided_slice %149 {offsets = [0, 32], sizes = [9, 32], strides = [1, 1]} : vector<9x96xf32> to vector<9x32xf32>
    %153 = arith.truncf %152 : vector<9x32xf32> to vector<9x32xbf16>
    %154 = vector.extract_strided_slice %149 {offsets = [0, 64], sizes = [9, 32], strides = [1, 1]} : vector<9x96xf32> to vector<9x32xf32>
    %155 = arith.truncf %154 : vector<9x32xf32> to vector<9x32xbf16>
    %156 = vector.shape_cast %151 : vector<9x32xbf16> to vector<1x9x32xbf16>
    %157 = vector.broadcast %156 : vector<1x9x32xbf16> to vector<4x9x32xbf16>
    %158 = vector.broadcast %6 : vector<4x1x32xbf16> to vector<4x9x32xbf16>
    %159 = arith.mulf %157, %158 : vector<4x9x32xbf16>
    %160 = vector.shape_cast %153 : vector<9x32xbf16> to vector<1x9x32xbf16>
    %161 = vector.broadcast %160 : vector<1x9x32xbf16> to vector<4x9x32xbf16>
    %cst_58 = arith.constant dense<0.000000e+00> : vector<4x9x9xf32>
    %162 = tpu.matmul %159, %161, %cst_58 {dimension_numbers = #tpu.dot_dimension_numbers<[2], [2], [1], [1], [0, 0, 0, 1, 1, 1], [0], [0]>} : vector<4x9x32xbf16>, vector<4x9x32xbf16>, vector<4x9x9xf32> -> vector<4x9x9xf32>
    %cst_59 = arith.constant dense<0xFF800000> : vector<4x9xf32>
    %163 = vector.multi_reduction <maximumf>, %162, %cst_59 [2] : vector<4x9x9xf32> to vector<4x9xf32>
    %164 = vector.shape_cast %163 : vector<4x9xf32> to vector<4x9x1xf32>
    %165 = vector.broadcast %164 : vector<4x9x1xf32> to vector<4x9x9xf32>
    %166 = arith.subf %162, %165 : vector<4x9x9xf32>
    %167 = math.exp %166 : vector<4x9x9xf32>
    %cst_60 = arith.constant dense<0.000000e+00> : vector<4x9xf32>
    %168 = vector.multi_reduction <add>, %167, %cst_60 [2] : vector<4x9x9xf32> to vector<4x9xf32>
    %169 = vector.shape_cast %168 : vector<4x9xf32> to vector<4x9x1xf32>
    %170 = tpu.reciprocal %169 {approx = true} : vector<4x9x1xf32> -> vector<4x9x1xf32>
    %171 = vector.broadcast %170 : vector<4x9x1xf32> to vector<4x9x9xf32>
    %172 = arith.mulf %167, %171 : vector<4x9x9xf32>
    %173 = vector.shape_cast %155 : vector<9x32xbf16> to vector<1x9x32xbf16>
    %174 = vector.broadcast %173 : vector<1x9x32xbf16> to vector<4x9x32xbf16>
    %175 = vector.broadcast %6 : vector<4x1x32xbf16> to vector<4x9x32xbf16>
    %176 = arith.mulf %174, %175 : vector<4x9x32xbf16>
    %177 = arith.truncf %172 : vector<4x9x9xf32> to vector<4x9x9xbf16>
    %cst_61 = arith.constant dense<0.000000e+00> : vector<4x9x32xf32>
    %178 = tpu.matmul %177, %176, %cst_61 {dimension_numbers = #tpu.dot_dimension_numbers<[2], [1], [1], [2], [0, 0, 0, 1, 1, 2], [0], [0]>} : vector<4x9x9xbf16>, vector<4x9x32xbf16>, vector<4x9x32xf32> -> vector<4x9x32xf32>
    %cst_62 = arith.constant dense<0.000000e+00> : vector<9x32xf32>
    %179 = vector.multi_reduction <add>, %178, %cst_62 [0] : vector<4x9x32xf32> to vector<9x32xf32>
    %180 = arith.truncf %179 : vector<9x32xf32> to vector<9x32xbf16>
    %181 = arith.index_cast %c1_i32 : i32 to index
    %c0_63 = arith.constant 0 : index
    %c0_64 = arith.constant 0 : index
    %182 = vector.load %arg7[%181, %c0_63, %c0_64] : memref<2x32x32xbf16, #tpu.memory_space<vmem>>, vector<1x32x32xbf16>
    %183 = vector.shape_cast %182 : vector<1x32x32xbf16> to vector<32x32xbf16>
    %cst_65 = arith.constant dense<0.000000e+00> : vector<9x32xf32>
    %184 = tpu.matmul %180, %183, %cst_65 {dimension_numbers = #tpu.dot_dimension_numbers<[1], [0], [0], [1], [0, 0, 1, 1], [], []>} : vector<9x32xbf16>, vector<32x32xbf16>, vector<9x32xf32> -> vector<9x32xf32>
    %185 = arith.addf %123, %184 : vector<9x32xf32>
    %186 = arith.index_cast %c1_i32 : i32 to index
    %c0_66 = arith.constant 0 : index
    %c0_67 = arith.constant 0 : index
    %187 = vector.load %arg8[%186, %c0_66, %c0_67] : memref<2x1x32xf32, #tpu.memory_space<vmem>>, vector<1x1x32xf32>
    %188 = vector.shape_cast %187 : vector<1x1x32xf32> to vector<1x32xf32>
    %189 = vector.broadcast %188 : vector<1x32xf32> to vector<9x32xf32>
    %190 = arith.addf %185, %189 : vector<9x32xf32>
    %cst_68 = arith.constant dense<0.000000e+00> : vector<9xf32>
    %191 = vector.multi_reduction <add>, %190, %cst_68 [1] : vector<9x32xf32> to vector<9xf32>
    %192 = vector.shape_cast %191 : vector<9xf32> to vector<9x1xf32>
    %cst_69 = arith.constant 3.200000e+01 : f32
    %193 = vector.broadcast %cst_69 : f32 to vector<9x1xf32>
    %194 = arith.divf %192, %193 : vector<9x1xf32>
    %195 = vector.broadcast %194 : vector<9x1xf32> to vector<9x32xf32>
    %196 = arith.subf %190, %195 : vector<9x32xf32>
    %197 = arith.mulf %196, %196 : vector<9x32xf32>
    %cst_70 = arith.constant dense<0.000000e+00> : vector<9xf32>
    %198 = vector.multi_reduction <add>, %197, %cst_70 [1] : vector<9x32xf32> to vector<9xf32>
    %199 = vector.shape_cast %198 : vector<9xf32> to vector<9x1xf32>
    %cst_71 = arith.constant 3.200000e+01 : f32
    %200 = vector.broadcast %cst_71 : f32 to vector<9x1xf32>
    %201 = arith.divf %199, %200 : vector<9x1xf32>
    %cst_72 = arith.constant 9.99999974E-6 : f32
    %202 = vector.broadcast %cst_72 : f32 to vector<9x1xf32>
    %203 = arith.addf %201, %202 : vector<9x1xf32>
    %204 = math.rsqrt %203 : vector<9x1xf32>
    %205 = vector.broadcast %204 : vector<9x1xf32> to vector<9x32xf32>
    %206 = arith.mulf %196, %205 : vector<9x32xf32>
    %207 = arith.truncf %206 : vector<9x32xf32> to vector<9x32xbf16>
    %208 = arith.index_cast %c1_i32 : i32 to index
    %c0_73 = arith.constant 0 : index
    %c0_74 = arith.constant 0 : index
    %209 = vector.load %arg9[%208, %c0_73, %c0_74] : memref<2x32x128xbf16, #tpu.memory_space<vmem>>, vector<1x32x128xbf16>
    %210 = vector.shape_cast %209 : vector<1x32x128xbf16> to vector<32x128xbf16>
    %cst_75 = arith.constant dense<0.000000e+00> : vector<9x128xf32>
    %211 = tpu.matmul %207, %210, %cst_75 {dimension_numbers = #tpu.dot_dimension_numbers<[1], [0], [0], [1], [0, 0, 1, 1], [], []>} : vector<9x32xbf16>, vector<32x128xbf16>, vector<9x128xf32> -> vector<9x128xf32>
    %212 = arith.index_cast %c1_i32 : i32 to index
    %c0_76 = arith.constant 0 : index
    %c0_77 = arith.constant 0 : index
    %213 = vector.load %arg10[%212, %c0_76, %c0_77] : memref<2x1x128xf32, #tpu.memory_space<vmem>>, vector<1x1x128xf32>
    %214 = vector.shape_cast %213 : vector<1x1x128xf32> to vector<1x128xf32>
    %215 = vector.broadcast %214 : vector<1x128xf32> to vector<9x128xf32>
    %216 = arith.addf %211, %215 : vector<9x128xf32>
    %cst_78 = arith.constant 5.000000e-01 : f32
    %217 = vector.broadcast %cst_78 : f32 to vector<9x128xf32>
    %218 = arith.mulf %217, %216 : vector<9x128xf32>
    %cst_79 = arith.constant 4.471500e-02 : f32
    %219 = vector.broadcast %cst_79 : f32 to vector<9x128xf32>
    %220 = arith.mulf %219, %216 : vector<9x128xf32>
    %221 = arith.mulf %220, %216 : vector<9x128xf32>
    %222 = arith.mulf %221, %216 : vector<9x128xf32>
    %223 = arith.addf %216, %222 : vector<9x128xf32>
    %cst_80 = arith.constant 0.797884583 : f32
    %224 = vector.broadcast %cst_80 : f32 to vector<9x128xf32>
    %225 = arith.mulf %224, %223 : vector<9x128xf32>
    %226 = math.tanh %225 : vector<9x128xf32>
    %cst_81 = arith.constant 1.000000e+00 : f32
    %227 = vector.broadcast %cst_81 : f32 to vector<9x128xf32>
    %228 = arith.addf %227, %226 : vector<9x128xf32>
    %229 = arith.mulf %218, %228 : vector<9x128xf32>
    %230 = arith.truncf %229 : vector<9x128xf32> to vector<9x128xbf16>
    %231 = arith.index_cast %c1_i32 : i32 to index
    %c0_82 = arith.constant 0 : index
    %c0_83 = arith.constant 0 : index
    %232 = vector.load %arg11[%231, %c0_82, %c0_83] : memref<2x128x32xbf16, #tpu.memory_space<vmem>>, vector<1x128x32xbf16>
    %233 = vector.shape_cast %232 : vector<1x128x32xbf16> to vector<128x32xbf16>
    %cst_84 = arith.constant dense<0.000000e+00> : vector<9x32xf32>
    %234 = tpu.matmul %230, %233, %cst_84 {dimension_numbers = #tpu.dot_dimension_numbers<[1], [0], [0], [1], [0, 0, 1, 1], [], []>} : vector<9x128xbf16>, vector<128x32xbf16>, vector<9x32xf32> -> vector<9x32xf32>
    %235 = arith.addf %190, %234 : vector<9x32xf32>
    %236 = arith.index_cast %c1_i32 : i32 to index
    %c0_85 = arith.constant 0 : index
    %c0_86 = arith.constant 0 : index
    %237 = vector.load %arg12[%236, %c0_85, %c0_86] : memref<2x1x32xf32, #tpu.memory_space<vmem>>, vector<1x1x32xf32>
    %238 = vector.shape_cast %237 : vector<1x1x32xf32> to vector<1x32xf32>
    %239 = vector.broadcast %238 : vector<1x32xf32> to vector<9x32xf32>
    %240 = arith.addf %235, %239 : vector<9x32xf32>
    %c2_i32 = arith.constant 2 : i32
    %cst_87 = arith.constant dense<0.000000e+00> : vector<32xf32>
    %241 = vector.multi_reduction <add>, %240, %cst_87 [0] : vector<9x32xf32> to vector<32xf32>
    %242 = vector.shape_cast %241 : vector<32xf32> to vector<1x32xf32>
    %cst_88 = arith.constant 0.111111112 : f32
    %243 = vector.broadcast %cst_88 : f32 to vector<1x32xf32>
    %244 = arith.mulf %242, %243 : vector<1x32xf32>
    %cst_89 = arith.constant dense<0.000000e+00> : vector<1xf32>
    %245 = vector.multi_reduction <add>, %244, %cst_89 [1] : vector<1x32xf32> to vector<1xf32>
    %246 = vector.shape_cast %245 : vector<1xf32> to vector<1x1xf32>
    %cst_90 = arith.constant 3.200000e+01 : f32
    %247 = vector.broadcast %cst_90 : f32 to vector<1x1xf32>
    %248 = arith.divf %246, %247 : vector<1x1xf32>
    %249 = vector.broadcast %248 : vector<1x1xf32> to vector<1x32xf32>
    %250 = arith.subf %244, %249 : vector<1x32xf32>
    %251 = arith.mulf %250, %250 : vector<1x32xf32>
    %cst_91 = arith.constant dense<0.000000e+00> : vector<1xf32>
    %252 = vector.multi_reduction <add>, %251, %cst_91 [1] : vector<1x32xf32> to vector<1xf32>
    %253 = vector.shape_cast %252 : vector<1xf32> to vector<1x1xf32>
    %cst_92 = arith.constant 3.200000e+01 : f32
    %254 = vector.broadcast %cst_92 : f32 to vector<1x1xf32>
    %255 = arith.divf %253, %254 : vector<1x1xf32>
    %cst_93 = arith.constant 9.99999974E-6 : f32
    %256 = vector.broadcast %cst_93 : f32 to vector<1x1xf32>
    %257 = arith.addf %255, %256 : vector<1x1xf32>
    %258 = math.rsqrt %257 : vector<1x1xf32>
    %259 = vector.broadcast %258 : vector<1x1xf32> to vector<1x32xf32>
    %260 = arith.mulf %250, %259 : vector<1x32xf32>
    %261 = arith.truncf %260 : vector<1x32xf32> to vector<1x32xbf16>
    %c0_94 = arith.constant 0 : index
    %c0_95 = arith.constant 0 : index
    %262 = vector.load %arg13[%c0_94, %c0_95] : memref<32x10xbf16, #tpu.memory_space<vmem>>, vector<32x10xbf16>
    %cst_96 = arith.constant dense<0.000000e+00> : vector<1x10xf32>
    %263 = tpu.matmul %261, %262, %cst_96 {dimension_numbers = #tpu.dot_dimension_numbers<[1], [0], [0], [1], [0, 0, 1, 1], [], []>} : vector<1x32xbf16>, vector<32x10xbf16>, vector<1x10xf32> -> vector<1x10xf32>
    %c0_97 = arith.constant 0 : index
    %c0_98 = arith.constant 0 : index
    %264 = vector.load %arg14[%c0_97, %c0_98] : memref<1x10xf32, #tpu.memory_space<vmem>>, vector<1x10xf32>
    %265 = arith.addf %263, %264 : vector<1x10xf32>
    %c0_99 = arith.constant 0 : index
    %c0_100 = arith.constant 0 : index
    %c0_101 = arith.constant 0 : index
    %266 = vector.load %arg15[%c0_99, %c0_100, %c0_101] : memref<1x1x10xf32, #tpu.memory_space<vmem>>, vector<1x1x10xf32>
    %267 = vector.shape_cast %266 : vector<1x1x10xf32> to vector<1x10xf32>
    %268 = vector.shape_cast %265 : vector<1x10xf32> to vector<1x1x10xf32>
    tpu.vector_store %arg15[%c0_99, %c0_100, %c0_101], %268 {strides = array<i32>} : memref<1x1x10xf32, #tpu.memory_space<vmem>>, vector<1x1x10xf32>,
    return
  }
  func.func @transform_0(%arg0: i32) -> (i32, i32, i32) {
    %c0_i32 = arith.constant 0 : i32
    %c0_i32_0 = arith.constant 0 : i32
    %c0_i32_1 = arith.constant 0 : i32
    return %arg0, %c0_i32, %c0_i32_0 : i32, i32, i32
  }
  func.func @transform_1(%arg0: i32) -> (i32, i32) {
    %c0_i32 = arith.constant 0 : i32
    %c0_i32_0 = arith.constant 0 : i32
    %c0_i32_1 = arith.constant 0 : i32
    return %c0_i32, %c0_i32_0 : i32, i32
  }
  func.func @transform_2(%arg0: i32) -> (i32, i32) {
    %c0_i32 = arith.constant 0 : i32
    %c0_i32_0 = arith.constant 0 : i32
    %c0_i32_1 = arith.constant 0 : i32
    return %c0_i32, %c0_i32_0 : i32, i32
  }
  func.func @transform_3(%arg0: i32) -> (i32, i32, i32) {
    %c0_i32 = arith.constant 0 : i32
    %c0_i32_0 = arith.constant 0 : i32
    %c0_i32_1 = arith.constant 0 : i32
    %c0_i32_2 = arith.constant 0 : i32
    return %c0_i32, %c0_i32_0, %c0_i32_1 : i32, i32, i32
  }
  func.func @transform_4(%arg0: i32) -> (i32, i32, i32) {
    %c0_i32 = arith.constant 0 : i32
    %c0_i32_0 = arith.constant 0 : i32
    %c0_i32_1 = arith.constant 0 : i32
    %c0_i32_2 = arith.constant 0 : i32
    return %c0_i32, %c0_i32_0, %c0_i32_1 : i32, i32, i32
  }
  func.func @transform_5(%arg0: i32) -> (i32, i32, i32) {
    %c0_i32 = arith.constant 0 : i32
    %c0_i32_0 = arith.constant 0 : i32
    %c0_i32_1 = arith.constant 0 : i32
    %c0_i32_2 = arith.constant 0 : i32
    return %c0_i32, %c0_i32_0, %c0_i32_1 : i32, i32, i32
  }
  func.func @transform_6(%arg0: i32) -> (i32, i32, i32) {
    %c0_i32 = arith.constant 0 : i32
    %c0_i32_0 = arith.constant 0 : i32
    %c0_i32_1 = arith.constant 0 : i32
    %c0_i32_2 = arith.constant 0 : i32
    return %c0_i32, %c0_i32_0, %c0_i32_1 : i32, i32, i32
  }
  func.func @transform_7(%arg0: i32) -> (i32, i32, i32) {
    %c0_i32 = arith.constant 0 : i32
    %c0_i32_0 = arith.constant 0 : i32
    %c0_i32_1 = arith.constant 0 : i32
    %c0_i32_2 = arith.constant 0 : i32
    return %c0_i32, %c0_i32_0, %c0_i32_1 : i32, i32, i32
  }
  func.func @transform_8(%arg0: i32) -> (i32, i32, i32) {
    %c0_i32 = arith.constant 0 : i32
    %c0_i32_0 = arith.constant 0 : i32
    %c0_i32_1 = arith.constant 0 : i32
    %c0_i32_2 = arith.constant 0 : i32
    return %c0_i32, %c0_i32_0, %c0_i32_1 : i32, i32, i32
  }
  func.func @transform_9(%arg0: i32) -> (i32, i32, i32) {
    %c0_i32 = arith.constant 0 : i32
    %c0_i32_0 = arith.constant 0 : i32
    %c0_i32_1 = arith.constant 0 : i32
    %c0_i32_2 = arith.constant 0 : i32
    return %c0_i32, %c0_i32_0, %c0_i32_1 : i32, i32, i32
  }
  func.func @transform_10(%arg0: i32) -> (i32, i32, i32) {
    %c0_i32 = arith.constant 0 : i32
    %c0_i32_0 = arith.constant 0 : i32
    %c0_i32_1 = arith.constant 0 : i32
    %c0_i32_2 = arith.constant 0 : i32
    return %c0_i32, %c0_i32_0, %c0_i32_1 : i32, i32, i32
  }
  func.func @transform_11(%arg0: i32) -> (i32, i32, i32) {
    %c0_i32 = arith.constant 0 : i32
    %c0_i32_0 = arith.constant 0 : i32
    %c0_i32_1 = arith.constant 0 : i32
    %c0_i32_2 = arith.constant 0 : i32
    return %c0_i32, %c0_i32_0, %c0_i32_1 : i32, i32, i32
  }
  func.func @transform_12(%arg0: i32) -> (i32, i32) {
    %c0_i32 = arith.constant 0 : i32
    %c0_i32_0 = arith.constant 0 : i32
    %c0_i32_1 = arith.constant 0 : i32
    return %c0_i32, %c0_i32_0 : i32, i32
  }
  func.func @transform_13(%arg0: i32) -> (i32, i32) {
    %c0_i32 = arith.constant 0 : i32
    %c0_i32_0 = arith.constant 0 : i32
    %c0_i32_1 = arith.constant 0 : i32
    return %c0_i32, %c0_i32_0 : i32, i32
  }
  func.func @transform_14(%arg0: i32) -> (i32, i32, i32) {
    %c0_i32 = arith.constant 0 : i32
    %c0_i32_0 = arith.constant 0 : i32
    %c0_i32_1 = arith.constant 0 : i32
    return %arg0, %c0_i32, %c0_i32_0 : i32, i32, i32
  }
}

</mosaic_0001>

<bundles_post_ra>
// kernel: vit_forward.1
= control target key start
LH: loop header
LB: loop body
LE: loop exit
PB: predicated region body
PF: predicated region fallthrough
CT: control target
= control target key end

     0   :  { %19 = vsyncpa [#allocation3], 0  ;;  %s4225_s0 = inlined_call_operand.vmem [shape: bf16[2,9,384], index: 0, kind: input, shape index: {}]   ;;  %s4226_s1 = inlined_call_operand.vmem [shape: bf16[384,32], index: 1, kind: input, shape index: {}]   ;;  %s4227_s2 = inlined_call_operand.vmem [shape: f32[9,32], index: 2, kind: input, shape index: {}]   ;;  %s4228_s3 = inlined_call_operand.vmem [shape: bf16[4,1,32], index: 3, kind: input, shape index: {}]   ;;  %s4229_s4 = inlined_call_operand.vmem [shape: bf16[2,32,96], index: 4, kind: input, shape index: {}]   ;;  %s4230_s5 = inlined_call_operand.vmem [shape: f32[2,1,96], index: 5, kind: input, shape index: {}]   ;;  %s4231_s6 = inlined_call_operand.vmem [shape: bf16[2,32,32], index: 6, kind: input, shape index: {}]   ;;  %s4232_s7 = inlined_call_operand.vmem [shape: f32[2,1,32], index: 7, kind: input, shape index: {}]   ;;  %s4233_s8 = inlined_call_operand.vmem [shape: bf16[2,32,128], index: 8, kind: input, shape index: {}]   ;;  %s4234_s9 = inlined_call_operand.vmem [shape: f32[2,1,128], index: 9, kind: input, shape index: {}]   ;;  %s4235_s10 = inlined_call_operand.vmem [shape: bf16[2,128,32], index: 10, kind: input, shape index: {}]   ;;  %s4236_s11 = inlined_call_operand.vmem [shape: f32[2,1,32], index: 11, kind: input, shape index: {}]   ;;  %s4237_s12 = inlined_call_operand.vmem [shape: bf16[32,10], index: 12, kind: input, shape index: {}]   ;;  %s4238_s13 = inlined_call_operand.vmem [shape: f32[1,10], index: 13, kind: input, shape index: {}]   ;;  %s4239_s14 = inlined_call_operand.hbm [shape: f32[2,1,10], index: 14, kind: output, shape index: {}]  }
   0x1   :  { %21 = vsyncpa [#allocation3 + $0x1], 0  ;;  %s3545_s29 = smov 0   ;;  %s3547_s30 = smov 0  }
   0x2   :  { %s3549_s15 = smov 0   ;;  %s3551_s16 = smov 0  }
   0x3 LB: > { %4244 = sst [smem:[#allocation5_spill]] %s3458_s15  ;;  %s3566_s17 = sadd.s32 4294967295, %s3462_s16   ;;  %s3462_s16 = sphi %s3551_s16, %s4251_s16   ;;  %s3458_s15 = sphi %s3549_s15, %s4253_s15   ;;  %s3454_s30 = sphi %s3547_s30, %s4255_s30   ;;  %s3450_s29 = sphi %s3545_s29, %s4254_s29  }
   0x4   : > { %s2765_s18 = sadd.s32 4294967294, %s3462_s16   ;;  %s3570_s19 = sadd.s32 1, %s3462_s16  }
   0x5   : > { %4245 = sst [smem:[#allocation6_spill]] %s3570_s19  ;;  %s333_s20 = sadd.s32 1, %s3458_s15 }
   0x6   : > { %s330_s21 = ssub.s32 %s3462_s16, %s3570_s19  ;;  %p343_p0 = scmp.ne.s32.totalorder %s3458_s15, %s3454_s30 }
   0x7   : > { %p331_p1 = scmp.eq.s32.totalorder %s330_s21, 0  ;;  %p344_p2 = scmp.eq.s32.totalorder %s3566_s17, 1 }
   0x8   : > { %p349_p3 = scmp.ne.s32.totalorder %s3454_s30, %s3450_s29  ;;  %p350_p4 = scmp.eq.s32.totalorder %s2765_s18, 1 }
   0x9   : > { %s3581_s22 = scalar_select %p331_p1, %s3458_s15, %s333_s20  }
   0xa   : > { %p3583_p5 = por %p344_p2, %p343_p0  ;;  %p3587_p6 = por %p350_p4, %p349_p3 }
   0xb   : > { %4246 = sst [smem:[#allocation7_spill]] %s3581_s22  ;;  %p2768_p7 = scmp.ge.s32.totalorder %s3462_s16, 1 }
   0xc   : > { %s4248_s24 = scalar_select %p3587_p6, 1, 0 }
   0xd   : > { %p415_p8 = scmp.lt.s32.totalorder %s3462_s16, 3 }
   0xe   : > { %4249 = sst [smem:[#allocation8_spill]] %s4248_s24 }
   0xf   : > { %p416_p9 = pnand %p2768_p7, %p415_p8 }
  0x10   : > { %v3252_v0 = vld [vmem:[%s4226_s1 + $0x40] sm:$0xff] (!%p416_p9)   ;;  %v3464_v2 = vmov (!%p416_p9), 0.0   ;;  %v3255_v4 = vld [vmem:[%s4226_s1 + $0x48] sm:$0xff] (!%p416_p9)   ;;  %vm3465_vm0 = vmmov (!%p416_p9), 0   ;;  %v3258_v7 = vld [vmem:[%s4226_s1 + $0x50] sm:$0xff] (!%p416_p9)   ;;  %p460_p10 = scmp.lt.s32.totalorder (!%p416_p9), %s3566_s17, 1 }
  0x11   : > { %419 = sbr.rel (%p416_p9) target bundleno = 5737 (0x1669), region = 76  ;;  %v3253_v1 = vld [vmem:[%s4226_s1] sm:$0xff] (!%p416_p9)   ;;  %2995 = vmatprep.subr.bf16.mxu1 (!%p416_p9), %v3464_v2  ;;  %2893 = vmatprep.subr.bf16.mxu0 (!%p416_p9), %v3252_v0  ;;  %v3256_v5 = vld [vmem:[%s4226_s1 + $0x8] sm:$0xff] (!%p416_p9)   ;;  %v3259_v8 = vld [vmem:[%s4226_s1 + $0x10] sm:$0xff] (!%p416_p9)   ;;  %vm766_vm1 = vcmask (!%p416_p9), 261120   ;;  %vm770_vm2 = vcmask (!%p416_p9), 253952  }
  0x12   : > { %v3254_v3 = vld [vmem:[%s4226_s1 + $0x80] sm:$0xff] (!%p416_p9)   ;;  %2894 = vmatpush3.bf16.msra.mxu0 (!%p416_p9), %v3253_v1  ;;  %3011 = vmatprep.mubr.msk.bf16.mxu1 (!%p416_p9), %vm3465_vm0, %v3464_v2  ;;  %v3257_v6 = vld [vmem:[%s4226_s1 + $0x88] sm:$0xff] (!%p416_p9)   ;;  %v3260_v9 = vld [vmem:[%s4226_s1 + $0x90] sm:$0xff] (!%p416_p9)   ;;  %s3466_s20 = smov (!%p416_p9), 96   ;;  %vm1078_vm3 = vcmask (!%p416_p9), 72704   ;;  %vm1082_vm4 = vcmask (!%p416_p9), 65536  }
  0x13   : > { %2996 = vmatpush3.bf16.msra.mxu1 (!%p416_p9), %v3254_v3  ;;  %2895 = vmatprep.subr.bf16.mxu0 (!%p416_p9), %v3255_v4  ;;  %v3261_v10 = vld [vmem:[%s4226_s1 + $0x58] sm:$0xff] (!%p416_p9)   ;;  %v3264_v13 = vld [vmem:[%s4226_s1 + $0x60] sm:$0xff] (!%p416_p9)   ;;  %v3267_v16 = vld [vmem:[%s4226_s1 + $0x68] sm:$0xff] (!%p416_p9)   ;;  %vm1198_vm5 = vcmask (!%p416_p9), 1043456   ;;  %vm1199_vm6 = vcmask (!%p416_p9), 1044480   ;;  %s2890_s19 = sshll.u32 (!%p416_p9), %s3566_s17, 4 }
  0x14   : > { %2997 = vmatprep.subr.bf16.mxu1 (!%p416_p9), %v3464_v2  ;;  %v3262_v11 = vld [vmem:[%s4226_s1 + $0x18] sm:$0xff] (!%p416_p9)   ;;  %v3265_v14 = vld [vmem:[%s4226_s1 + $0x20] sm:$0xff] (!%p416_p9)   ;;  %v3268_v17 = vld [vmem:[%s4226_s1 + $0x28] sm:$0xff] (!%p416_p9)   ;;  %vm2695_vm7 = vcmask (!%p416_p9), 73728   ;;  %s4183_s18 = scalar_lea.hbm (!%p416_p9), %s4239_s14, %s2890_s19 }
  0x15   : > { %v3263_v12 = vld [vmem:[%s4226_s1 + $0x98] sm:$0xff] (!%p416_p9)   ;;  %v3266_v15 = vld [vmem:[%s4226_s1 + $0xa0] sm:$0xff] (!%p416_p9)   ;;  %v3269_v18 = vld [vmem:[%s4226_s1 + $0xa8] sm:$0xff] (!%p416_p9)  }
  0x16   : > { %2896 = vmatpush3.bf16.msra.mxu0 (!%p416_p9), %v3256_v5  ;;  %v3270_v19 = vld [vmem:[%s4226_s1 + $0x70] sm:$0xff] (!%p416_p9)   ;;  %v3273_v22 = vld [vmem:[%s4226_s1 + $0x78] sm:$0xff] (!%p416_p9)   ;;  %v518_v30 = vld [vmem:[%s4227_s2] sm:$0xff] (!%p416_p9) }
  0x17   : > { %2998 = vmatpush3.bf16.msra.mxu1 (!%p416_p9), %v3257_v6  ;;  %2897 = vmatprep.subr.bf16.mxu0 (!%p416_p9), %v3258_v7  ;;  %v3271_v20 = vld [vmem:[%s4226_s1 + $0x30] sm:$0xff] (!%p416_p9)   ;;  %v3274_v24 = vld [vmem:[%s4226_s1 + $0x38] sm:$0xff] (!%p416_p9)   ;;  %v519_v36 = vld [vmem:[%s4227_s2 + $0x8] sm:$0x1] (!%p416_p9) }
  0x18   : > { %2999 = vmatprep.subr.bf16.mxu1 %v3464_v2  ;;  %s461_s27 = scalar_select %p460_p10, %s3566_s17, 1  ;;  %v3272_v21 = vld [vmem:[%s4226_s1 + $0xb0] sm:$0xff]   ;;  %v3278_v25 = vld [vmem:[%s4226_s1 + $0xb8] sm:$0xff]   ;;  %v3280_v56 = vld [vmem:[%s4229_s4] sm:$0xff]  }
  0x19   : > { %v3281_v57 = vld [vmem:[%s4229_s4 + $0x8] sm:$0xff]   ;;  %v2797_v6 = vld [vmem:[%s4230_s5] ss:$0 sm:$0xff] }
  0x1a   : > { %2898 = vmatpush3.bf16.msra.mxu0 %v3259_v8  ;;  %s3207_s25 = smul.u32 24, %s461_s27 }
  0x1b   : > { %3000 = vmatpush3.bf16.msra.mxu1 %v3260_v9  ;;  %2899 = vmatprep.subr.bf16.mxu0 %v3261_v10 }
  0x1c   : > { %3001 = vmatprep.subr.bf16.mxu1 %v3464_v2  ;;  %s464_s27 = scalar_lea.vmem %s4225_s0, %s3207_s25  ;;  %s3467_s25 = smov 64  }
  0x1d   : > { %v3277_v23 = vld [vmem:[%s464_s27 + $0x4] ss:$12 sps:$4 sm:$0x1f]   ;;  %v3275_v26 = vld [vmem:[%s464_s27] ss:$12 sps:$4 sm:$0x1f]  }
  0x1e   : > { %2900 = vmatpush3.bf16.msra.mxu0 %v3262_v11  ;;  %712 = vmatprep.mubr.bf16.mxu0 %v3277_v23  ;;  %v3279_v27 = vld [vmem:[%s464_s27 + $0x8] ss:$12 sps:$4 sm:$0x1f]  }
  0x1f   : > { %3002 = vmatpush3.bf16.msra.mxu1 %v3263_v12  ;;  %2901 = vmatprep.subr.bf16.mxu0 %v3264_v13 }
  0x20   : > { %3003 = vmatprep.subr.bf16.mxu1 %v3464_v2 }
  0x22   : > { %2902 = vmatpush3.bf16.msra.mxu0 %v3265_v14  ;;  %v867_v14 = vlaneseq }
  0x23   : > { %3004 = vmatpush3.bf16.msra.mxu1 %v3266_v15  ;;  %2903 = vmatprep.subr.bf16.mxu0 %v3267_v16  ;;  %v762_v16 = vld [vmem:[%s4228_s3] sm:$0x1] }
  0x24   : > { %3005 = vmatprep.subr.bf16.mxu1 %v3464_v2  ;;  %v868_v15 = vshrl.u32 %v867_v14, 7 }
  0x26   : > { %2904 = vmatpush3.bf16.msra.mxu0 %v3268_v17  ;;  %v763_v17 = vld [vmem:[%s4228_s3 + $0x1] sm:$0x1] }
  0x27   : > { %3006 = vmatpush3.bf16.msra.mxu1 %v3269_v18  ;;  %2905 = vmatprep.subr.bf16.mxu0 %v3270_v19  ;;  %v865_v18 = vpack.i.b16 %v762_v16, %v762_v16  ;;  %v869_v19 = vsub.s32 0, %v868_v15 }
  0x28   : > { %3007 = vmatprep.subr.bf16.mxu1 %v3464_v2 }
  0x29   : > { %v3729_v23 = vrot.slane %v865_v18, %v869_v19 }
  0x2a   : > { %2906 = vmatpush3.bf16.msra.mxu0 %v3271_v20  ;;  %v872_v20 = vpack.i.b16 %v763_v17, %v763_v17 }
  0x2b   : > { %3008 = vmatpush3.bf16.msra.mxu1 %v3272_v21  ;;  %2907 = vmatprep.subr.bf16.mxu0 %v3273_v22 }
  0x2c   : > { %3009 = vmatprep.subr.bf16.mxu1 %v3464_v2 }
  0x2e   : > { %2908 = vmatpush3.bf16.msra.mxu0 %v3274_v24  ;;  %v3731_v24 = vrot.slane %v872_v20, %v869_v19 }
  0x2f   : > { %3010 = vmatpush3.bf16.msra.mxu1 %v3278_v25  ;;  %3029 = vmatprep.subr.bf16.mxu0 %v3464_v2  ;;  %v764_v25 = vld [vmem:[%s4228_s3 + $0x2] sm:$0x1] }
  0x30   : > { %3015 = vmatprep.subr.bf16.mxu1 %v3464_v2 }
  0x31   : > { %713 = vmatmul.mubr.bf16.vlgmr.msra.gmra.mrb[0].mxu0 %v3275_v26  ;;  %v765_v26 = vld [vmem:[%s4228_s3 + $0x3] sm:$0x1] }
  0x32   : > { %3012 = vmatmul.mubr.bf16.vlgmr.msra.gmra.mrb[0].mxu1 %v3279_v27  ;;  %3031 = vmatprep.mubr.msk.bf16.mxu0 %vm3465_vm0, %v3464_v2 }
  0x33   : > { %3019 = vmatprep.mubr.msk.bf16.mxu1 %vm3465_vm0, %v3464_v2  ;;  %3016 = vmatpush3.bf16.msra.mxu1 %v3280_v56 }
  0x34   : > { %3017 = vmatprep.subr.bf16.mxu1 %v3464_v2 }
  0x37   : > { %3018 = vmatpush3.bf16.msra.mxu1 %v3281_v57 }
  0x38   : > { %3023 = vmatprep.subr.bf16.mxu1 %v3464_v2 }
 0x104   : > { %v2909_v28 = vpop.f32.mrb[0].mxu0 }
 0x105   : > { %v2910_v29 = vpop.f32.mrb[1].mxu0  ;;  %v755_v31 = vpop.f32.mrb[0].mxu1 }
 0x106   : > { %v2911_v32 = vadd.f32 %v2910_v29, %v2909_v28  ;;  %v2912_v33 = vpop.f32.mrb[2].mxu0  ;;  %v3013_v34 = vpop.f32.mrb[1].mxu1  ;;  %v879_v29 = vpack.i.b16 %v764_v25, %v764_v25 }
 0x107   : > { %v2913_v35 = vpop.f32.mrb[3].mxu0  ;;  %v758_v37 = vpop.f32.mrb[2].mxu1 }
 0x108   : > { %v715_v38 = vadd.f32 %v2911_v32, %v518_v30  ;;  %v2914_v39 = vadd.f32 %v2913_v35, %v2912_v33  ;;  %v3014_v40 = vpop.f32.mrb[3].mxu1  ;;  %v886_v30 = vpack.i.b16 %v765_v26, %v765_v26 }
 0x10a   : > { %v3692_v41 = vadd.f32 %v755_v31, %v715_v38  ;;  %v718_v42 = vadd.f32 %v2914_v39, %v519_v36  ;;  %v3751_v31 = vrot.slane %v879_v29, %v869_v19  ;;  %v3753_v32 = vrot.slane %v886_v30, %v869_v19 }
 0x10c   : > { %v3694_v43 = vadd.f32 %v758_v37, %v718_v42  ;;  %v767_v44 = vsel %vm766_vm1, %v3692_v41, 0.0 }
 0x10d   : > { %768 = vadd.xlane.f32.xlu0 %v767_v44 }
 0x10e   : > { %v771_v45 = vsel %vm770_vm2, %v3694_v43, 0.0 }
 0x111   : > { %772 = vadd.xlane.f32.xlu0 %v771_v45 }
 0x19a   : > { %v769_v46 = vpop.xlane.xlu0 %768 }
 0x19b   : > { %v775_v47 = vmul.f32 0.03125, %v769_v46 }
 0x19d   : > { %v777_v48 = vsub.f32 %v3692_v41, %v775_v47 }
 0x19e   : > { %v773_v49 = vpop.xlane.xlu0 %772 }
 0x19f   : > { %v776_v50 = vmul.f32 0.03125, %v773_v49  ;;  %v779_v51 = vmul.f32 %v777_v48, %v777_v48 }
 0x1a1   : > { %v778_v52 = vsub.f32 %v3694_v43, %v776_v50  ;;  %v781_v53 = vsel %vm766_vm1, %v779_v51, 0.0 }
 0x1a2   : > { %782 = vadd.xlane.f32.xlu1 %v781_v53 }
 0x1a3   : > { %v780_v54 = vmul.f32 %v778_v52, %v778_v52 }
 0x1a5   : > { %v784_v55 = vsel %vm770_vm2, %v780_v54, 0.0 }
 0x1a6   : > { %785 = vadd.xlane.f32.xlu1 %v784_v55 }
 0x22f   : > { %v783_v58 = vpop.xlane.xlu1 %782 }
 0x230   : > { %v787_v59 = vmul.f32 0.03125, %v783_v58 }
 0x232   : > { %v789_v60 = vadd.f32 1e-05, %v787_v59 }
 0x233   : > { %v786_v61 = vpop.xlane.xlu1 %785 }
 0x234   : > { %v788_v62 = vmul.f32 0.03125, %v786_v61  ;;  %3310 = vrsqrt.f32 %v789_v60 }
 0x236   : > { %v790_v63 = vadd.f32 1e-05, %v788_v62 }
 0x238   : > { %3312 = vrsqrt.f32 %v790_v63 }
 0x23e   : > { %v3311_v0 = vpop.eup %3310 }
 0x23f   : > { %v793_v3 = vmul.f32 %v3311_v0, %v777_v48 }
 0x242   : > { %v3313_v1 = vpop.eup %3312 }
 0x243   : > { %v794_v4 = vmul.f32 %v3313_v1, %v778_v52 }
 0x245   : > { %v795_v5 = vpack.c.bf16 %v794_v4, %v793_v3 }
 0x247   : > { %3020 = vmatmul.mubr.msk.bf16.vlgmr.msra.gmra.mrb[4].mxu1 %vm766_vm1, %v795_v5 }
 0x248   : > { %3025 = vmatprep.mubr.msk.bf16.mxu1 %vm3465_vm0, %v3464_v2 }
 0x31a   : > { %v856_v7 = vpop.f32.mrb[4].mxu1 }
 0x31b   : > { %v3021_v8 = vpop.f32.mrb[5].mxu1  ;;  %v857_v10 = vadd.f32 %v2797_v6, %v856_v7 }
 0x31c   : > { %v859_v9 = vpop.f32.mrb[6].mxu1 }
 0x31d   : > { %v860_v11 = vadd.f32 %v2797_v6, %v859_v9  ;;  %v3022_v12 = vpop.f32.mrb[7].mxu1 }
 0x31f   : > { %v3718_v13 = vpack.c.bf16 %v860_v11, %v857_v10 }
 0x321   : > { %897 = vrot.lane.b32.xlu0 %v3718_v13, %s3466_s20  ;;  %v892_v27 = vmul.bf16 %v3729_v23, %v3718_v13  ;;  %v893_v28 = vmul.bf16 %v3731_v24, %v3718_v13  ;;  %v894_v33 = vmul.bf16 %v3751_v31, %v3718_v13  ;;  %v895_v34 = vmul.bf16 %v3753_v32, %v3718_v13 }
 0x393   : > { %v898_v21 = vpop.permute.xlu0 %897 }
 0x394   : > { %v903_v22 = vsel %vm766_vm1, %v898_v21, 0 }
 0x395   : > { %3024 = vmatpush3.bf16.xpose.msra.mxu1 %v903_v22  ;;  %3030 = vmatpush3.bf16.xpose.msra.mxu0 %v903_v22 }
 0x396   : > { %3035 = vmatprep.subr.bf16.mxu1 %v3464_v2  ;;  %3041 = vmatprep.subr.bf16.mxu0 %v3464_v2 }
 0x39c   : > { %3026 = vmatmul.mubr.msk.bf16.vlgmr.msra.gmra.mrb[8].mxu1 %vm766_vm1, %v892_v27  ;;  %3032 = vmatmul.mubr.msk.bf16.vlgmr.msra.gmra.mrb[4].mxu0 %vm766_vm1, %v893_v28 }
 0x39d   : > { %3036 = vmatpush3.bf16.xpose.msra.mxu1 %v903_v22  ;;  %3042 = vmatpush3.bf16.xpose.msra.mxu0 %v903_v22 }
 0x39e   : > { %3037 = vmatprep.mubr.msk.bf16.mxu1 %vm3465_vm0, %v3464_v2  ;;  %3043 = vmatprep.mubr.msk.bf16.mxu0 %vm3465_vm0, %v3464_v2 }
 0x39f   : > { %3047 = vmatprep.subr.bf16.mxu1 %v3464_v2  ;;  %3053 = vmatprep.subr.bf16.mxu0 %v3464_v2 }
 0x3a4   : > { %3038 = vmatmul.mubr.msk.bf16.vlgmr.msra.gmra.mrb[12].mxu1 %vm766_vm1, %v894_v33  ;;  %3044 = vmatmul.mubr.msk.bf16.vlgmr.msra.gmra.mrb[8].mxu0 %vm766_vm1, %v895_v34 }
 0x3a5   : > { %3049 = vmatprep.mubr.msk.bf16.mxu1 %vm3465_vm0, %v3464_v2  ;;  %3055 = vmatprep.mubr.msk.bf16.mxu0 %vm3465_vm0, %v3464_v2 }
 0x46f   : > { %v939_v35 = vpop.f32.mrb[8].mxu1  ;;  %v983_v36 = vpop.f32.mrb[4].mxu0 }
 0x470   : > { %v3027_v37 = vpop.f32.mrb[9].mxu1  ;;  %v3033_v38 = vpop.f32.mrb[5].mxu0  ;;  %v1079_v39 = vsel %vm1078_vm3, %v939_v35, -inf  ;;  %v1086_v46 = vsel %vm1078_vm3, %v983_v36, -inf }
 0x471   : > { %v986_v40 = vpop.f32.mrb[6].mxu0  ;;  %1080 = vmax.xlane.f32.xlu1 %v1079_v39  ;;  %v942_v42 = vpop.f32.mrb[10].mxu1 }
 0x472   : > { %v3028_v44 = vpop.f32.mrb[11].mxu1  ;;  %v3034_v45 = vpop.f32.mrb[7].mxu0  ;;  %v1083_v52 = vsel %vm1082_vm4, %v942_v42, -inf  ;;  %v1089_v57 = vsel %vm1082_vm4, %v986_v40, -inf }
 0x475   : > { %1087 = vmax.xlane.f32.xlu1 %v1086_v46 }
 0x477   : > { %v1027_v47 = vpop.f32.mrb[12].mxu1  ;;  %v1071_v48 = vpop.f32.mrb[8].mxu0 }
 0x478   : > { %v3039_v49 = vpop.f32.mrb[13].mxu1  ;;  %v3045_v50 = vpop.f32.mrb[9].mxu0  ;;  %v1098_v51 = vsel %vm1078_vm3, %v1071_v48, -inf  ;;  %v1092_v58 = vsel %vm1078_vm3, %v1027_v47, -inf }
 0x479   : > { %1099 = vmax.xlane.f32.xlu0 %v1098_v51  ;;  %v3771_v53 = vpop.f32.mrb[10].mxu0  ;;  %1084 = vmax.xlane.f32.xlu1 %v1083_v52  ;;  %v3773_v54 = vpop.f32.mrb[14].mxu1 }
 0x47a   : > { %v3040_v55 = vpop.f32.mrb[15].mxu1  ;;  %v3046_v56 = vpop.f32.mrb[11].mxu0  ;;  %v1095_v59 = vsel %vm1082_vm4, %v3773_v54, -inf  ;;  %v1101_v60 = vsel %vm1082_vm4, %v3771_v53, -inf }
 0x47d   : > { %1090 = vmax.xlane.f32.xlu1 %v1089_v57 }
 0x481   : > { %1093 = vmax.xlane.f32.xlu1 %v1092_v58 }
 0x48f   : > { %1178 = vrot.lane.b32.xlu0 %v3753_v32, %s3467_s25 }
 0x492   : > { %1172 = vrot.lane.b32.xlu1 %v3729_v23, %s3467_s25 }
 0x496   : > { %1174 = vrot.lane.b32.xlu1 %v3731_v24, %s3467_s25 }
 0x49a   : > { %1176 = vrot.lane.b32.xlu1 %v3751_v31, %s3467_s25 }
 0x4be   : > { %1096 = vmax.xlane.f32.xlu1 %v1095_v59 }
 0x4c2   : > { %1102 = vmax.xlane.f32.xlu1 %v1101_v60 }
 0x4fe   : > { %v1081_v61 = vpop.xlane.xlu1 %1080 }
 0x4ff   : > { %v1104_v9 = vsub.f32 %v939_v35, %v1081_v61 }
 0x501   : > { %v1112_v10 = vmul.f32 1.442695, %v1104_v9 }
 0x502   : > { %v1088_v62 = vpop.xlane.xlu1 %1087 }
 0x503   : > { %v1106_v11 = vsub.f32 %v983_v36, %v1088_v62 }
 0x505   : > { %v1116_v12 = vmul.f32 1.442695, %v1106_v11 }
 0x506   : > { %v1085_v63 = vpop.xlane.xlu1 %1084  ;;  %v1100_v17 = vpop.xlane.xlu0 %1099 }
 0x507   : > { %v1105_v0 = vsub.f32 %v942_v42, %v1085_v63  ;;  %v1110_v18 = vsub.f32 %v1071_v48, %v1100_v17 }
 0x509   : > { %v1114_v1 = vmul.f32 1.442695, %v1105_v0  ;;  %v1124_v21 = vmul.f32 1.442695, %v1110_v18 }
 0x50a   : > { %v1091_v3 = vpop.xlane.xlu1 %1090  ;;  %v3828_v50 = vpop.permute.xlu0 %1178 }
 0x50b   : > { %3314 = vpow2.f32 %v1114_v1  ;;  %v1107_v14 = vsub.f32 %v986_v40, %v1091_v3  ;;  %v1187_v51 = vmul.bf16 %v3828_v50, %v3718_v13 }
 0x50c   : > { %3316 = vpow2.f32 %v1112_v10 }
 0x50d   : > { %3318 = vpow2.f32 %v1116_v12  ;;  %v1118_v15 = vmul.f32 1.442695, %v1107_v14 }
 0x50e   : > { %v1094_v4 = vpop.xlane.xlu1 %1093 }
 0x50f   : > { %v1108_v16 = vsub.f32 %v1027_v47, %v1094_v4  ;;  %3320 = vpow2.f32 %v1118_v15 }
 0x511   : > { %v1120_v19 = vmul.f32 1.442695, %v1108_v16 }
 0x512   : > { %v3789_v5 = vpop.permute.xlu1 %1172 }
 0x513   : > { %v1184_v6 = vmul.bf16 %v3789_v5, %v3718_v13  ;;  %3322 = vpow2.f32 %v1120_v19 }
 0x514   : > { %3324 = vpow2.f32 %v1124_v21 }
 0x515   : > { %1193 = vrot.lane.b32.xlu1 %v1184_v6, %s3467_s25  ;;  %v3794_v7 = vpop.eup %3314 }
 0x516   : > { %v1131_v8 = vsel %vm1082_vm4, %v3794_v7, 0.0  ;;  %v3317_v20 = vpop.eup %3316  ;;  %v3809_v30 = vpop.permute.xlu1 %1174 }
 0x517   : > { %1132 = vadd.xlane.f32.xlu0 %v1131_v8  ;;  %v1128_v22 = vsel %vm1078_vm3, %v3317_v20, 0.0  ;;  %v3799_v25 = vpop.eup %3318  ;;  %v1185_v52 = vmul.bf16 %v3809_v30, %v3718_v13 }
 0x518   : > { %v1134_v26 = vsel %vm1078_vm3, %v3799_v25, 0.0 }
 0x519   : > { %v3803_v27 = vpop.eup %3320 }
 0x51a   : > { %v1137_v28 = vsel %vm1082_vm4, %v3803_v27, 0.0  ;;  %v3815_v35 = vpop.permute.xlu1 %1176 }
 0x51b   : > { %v1186_v49 = vmul.bf16 %v3815_v35, %v3718_v13 }
 0x51d   : > { %v3807_v29 = vpop.eup %3322 }
 0x51e   : > { %v1140_v33 = vsel %vm1078_vm3, %v3807_v29, 0.0  ;;  %v3813_v34 = vpop.eup %3324 }
 0x51f   : > { %v1146_v36 = vsel %vm1078_vm3, %v3813_v34, 0.0 }
 0x539   : > { %1129 = vadd.xlane.f32.xlu1 %v1128_v22 }
 0x53d   : > { %1135 = vadd.xlane.f32.xlu1 %v1134_v26 }
 0x541   : > { %1138 = vadd.xlane.f32.xlu1 %v1137_v28 }
 0x545   : > { %1141 = vadd.xlane.f32.xlu1 %v1140_v33 }
 0x549   : > { %1147 = vadd.xlane.f32.xlu1 %v1146_v36 }
 0x54b   : > { %v1097_v37 = vpop.xlane.xlu1 %1096 }
 0x54c   : > { %v1109_v38 = vsub.f32 %v3773_v54, %v1097_v37  ;;  %v3282_v37 = vld [vmem:[%s4231_s6] sm:$0xff]  }
 0x54e   : > { %v1122_v39 = vmul.f32 1.442695, %v1109_v38  ;;  %v3283_v38 = vld [vmem:[%s4231_s6 + $0x8] sm:$0xff]  }
 0x54f   : > { %v1103_v40 = vpop.xlane.xlu1 %1102 }
 0x550   : > { %3326 = vpow2.f32 %v1122_v39  ;;  %v1111_v42 = vsub.f32 %v3771_v53, %v1103_v40  ;;  %v3468_v53 = vmov 65535  }
 0x551   : > { %v1200_v54 = vsel %vm1198_vm5, 4294967295, %v3468_v53 }
 0x552   : > { %v1126_v44 = vmul.f32 1.442695, %v1111_v42  ;;  %v3837_v55 = vsel %vm1199_vm6, %v1200_v54, 0 }
 0x554   : > { %3328 = vpow2.f32 %v1126_v44 }
 0x55a   : > { %v3327_v45 = vpop.eup %3326 }
 0x55b   : > { %v1143_v46 = vsel %vm1082_vm4, %v3327_v45, 0.0 }
 0x55c   : > { %1144 = vadd.xlane.f32.xlu1 %v1143_v46 }
 0x55e   : > { %v3822_v47 = vpop.eup %3328 }
 0x55f   : > { %v1149_v48 = vsel %vm1082_vm4, %v3822_v47, 0.0 }
 0x560   : > { %1150 = vadd.xlane.f32.xlu0 %v1149_v48 }
 0x56d   : > { %1297 = vrot.lane.b32.xlu1 %v1186_v49, %s3467_s25 }
 0x571   : > { %1347 = vrot.lane.b32.xlu1 %v1187_v51, %s3467_s25 }
 0x576   : > { %1247 = vrot.lane.b32.xlu0 %v1185_v52, %s3467_s25 }
 0x587   : > { %v1194_v56 = vpop.permute.xlu1 %1193 }
 0x588   : > { %v1203_v57 = vand.u32 %v3837_v55, %v1194_v56 }
 0x58a   : > { %3048 = vmatpush3.bf16.msra.mxu1 %v1203_v57 }
 0x58b   : > { %3059 = vmatprep.subr.bf16.mxu1 %v3464_v2 }
 0x5a4   : > { %v1133_v58 = vpop.xlane.xlu0 %1132 }
 0x5a5   : > { %3330 = vrcp.f32 %v1133_v58 }
 0x5af   : > { %v3331_v60 = vpop.eup %3330 }
 0x5b0   : > { %v1161_v61 = vmul.f32 %v3331_v60, %v3794_v7 }
 0x5c6   : > { %v1130_v59 = vpop.xlane.xlu1 %1129 }
 0x5c7   : > { %3332 = vrcp.f32 %v1130_v59 }
 0x5ca   : > { %v1136_v63 = vpop.xlane.xlu1 %1135 }
 0x5ce   : > { %v1139_v1 = vpop.xlane.xlu1 %1138 }
 0x5cf   : > { %3334 = vrcp.f32 %v1139_v1 }
 0x5d0   : > { %3336 = vrcp.f32 %v1136_v63 }
 0x5d1   : > { %v3333_v13 = vpop.eup %3332 }
 0x5d2   : > { %v1160_v62 = vmul.f32 %v3333_v13, %v3317_v20  ;;  %v1142_v3 = vpop.xlane.xlu1 %1141 }
 0x5d3   : > { %3338 = vrcp.f32 %v1142_v3 }
 0x5d4   : > { %v1188_v0 = vpack.c.bf16 %v1161_v61, %v1160_v62 }
 0x5d6   : > { %3050 = vmatmul.mubr.msk.bf16.vlgmr.msra.gmra.mrb[16].mxu1 %vm1078_vm3, %v1188_v0  ;;  %v1148_v4 = vpop.xlane.xlu1 %1147 }
 0x5d7   : > { %3061 = vmatprep.mubr.msk.bf16.mxu1 %vm3465_vm0, %v3464_v2 }
 0x5d9   : > { %v3335_v7 = vpop.eup %3334 }
 0x5da   : > { %v3337_v11 = vpop.eup %3336  ;;  %v1163_v12 = vmul.f32 %v3335_v7, %v3803_v27 }
 0x5db   : > { %v1162_v17 = vmul.f32 %v3337_v11, %v3799_v25  ;;  %v2812_v11 = vld [vmem:[%s4232_s7] ss:$0 sm:$0xff] }
 0x5dd   : > { %v3339_v15 = vpop.eup %3338  ;;  %v1189_v22 = vpack.c.bf16 %v1163_v12, %v1162_v17 }
 0x5de   : > { %v1164_v20 = vmul.f32 %v3339_v15, %v3807_v29 }
 0x5e9   : > { %v1145_v6 = vpop.xlane.xlu1 %1144 }
 0x5ea   : > { %3340 = vrcp.f32 %v1145_v6 }
 0x5eb   : > { %3342 = vrcp.f32 %v1148_v4 }
 0x5ed   : > { %v1151_v8 = vpop.xlane.xlu0 %1150  ;;  %v1298_v9 = vpop.permute.xlu1 %1297 }
 0x5ee   : > { %3344 = vrcp.f32 %v1151_v8  ;;  %v1303_v10 = vand.u32 %v1298_v9, %v3837_v55 }
 0x5f0   : > { %3060 = vmatpush3.bf16.msra.mxu1 %v1303_v10 }
 0x5f1   : > { %v1248_v14 = vpop.permute.xlu0 %1247  ;;  %3071 = vmatprep.subr.bf16.mxu1 %v3464_v2  ;;  %v1348_v18 = vpop.permute.xlu1 %1347 }
 0x5f2   : > { %v1253_v16 = vand.u32 %v1248_v14, %v3837_v55  ;;  %v1353_v26 = vand.u32 %v1348_v18, %v3837_v55 }
 0x5f4   : > { %v3341_v19 = vpop.eup %3340  ;;  %3054 = vmatpush3.bf16.msra.mxu0 %v1253_v16 }
 0x5f5   : > { %v1165_v21 = vmul.f32 %v3341_v19, %v3327_v45  ;;  %3065 = vmatprep.subr.bf16.mxu0 %v3464_v2  ;;  %v3343_v27 = vpop.eup %3342 }
 0x5f6   : > { %v1166_v29 = vmul.f32 %v3343_v27, %v3813_v34 }
 0x5f7   : > { %3056 = vmatmul.mubr.msk.bf16.vlgmr.msra.gmra.mrb[12].mxu0 %vm1078_vm3, %v1189_v22  ;;  %v1190_v28 = vpack.c.bf16 %v1165_v21, %v1164_v20 }
 0x5f8   : > { %v3345_v33 = vpop.eup %3344  ;;  %3066 = vmatpush3.bf16.msra.mxu0 %v1353_v26  ;;  %3067 = vmatprep.mubr.msk.bf16.mxu0 %vm3465_vm0, %v3464_v2 }
 0x5f9   : > { %v1167_v25 = vmul.f32 %v3345_v33, %v3822_v47  ;;  %3062 = vmatmul.mubr.msk.bf16.vlgmr.msra.gmra.mrb[20].mxu1 %vm1078_vm3, %v1190_v28  ;;  %3079 = vmatprep.subr.bf16.mxu0 %v3464_v2 }
 0x5fa   : > { %3075 = vmatprep.mubr.msk.bf16.mxu1 %vm3465_vm0, %v3464_v2  ;;  %3072 = vmatpush3.bf16.msra.mxu1 %v3282_v37  ;;  %v3284_v37 = vld [vmem:[%s4233_s8] sm:$0xff]  }
 0x5fb   : > { %v1191_v36 = vpack.c.bf16 %v1167_v25, %v1166_v29  ;;  %3073 = vmatprep.subr.bf16.mxu1 %v3464_v2 }
 0x5fe   : > { %3074 = vmatpush3.bf16.msra.mxu1 %v3283_v38  ;;  %v3285_v38 = vld [vmem:[%s4233_s8 + $0x8] sm:$0xff]  }
 0x5ff   : > { %3068 = vmatmul.mubr.msk.bf16.vlgmr.msra.gmra.mrb[16].mxu0 %vm1078_vm3, %v1191_v36  ;;  %3087 = vmatprep.subr.bf16.mxu1 %v3464_v2 }
 0x600   : > { %3083 = vmatprep.mubr.msk.bf16.mxu0 %vm3465_vm0, %v3464_v2  ;;  %3080 = vmatpush3.bf16.msra.mxu0 %v3284_v37 }
 0x601   : > { %3081 = vmatprep.subr.bf16.mxu0 %v3464_v2 }
 0x604   : > { %3082 = vmatpush3.bf16.msra.mxu0 %v3285_v38 }
 0x605   : > { %3107 = vmatprep.subr.bf16.mxu0 %v3464_v2 }
 0x6a9   : > { %v1239_v34 = vpop.f32.mrb[16].mxu1 }
 0x6aa   : > { %v3051_v39 = vpop.f32.mrb[17].mxu1  ;;  %v1396_v45 = vsel %vm766_vm1, %v1239_v34, 0.0 }
 0x6ab   : > { %v1242_v40 = vpop.f32.mrb[18].mxu1 }
 0x6ac   : > { %v3052_v42 = vpop.f32.mrb[19].mxu1  ;;  %v1403_v52 = vsel %vm770_vm2, %v1242_v40, 0.0 }
 0x6ca   : > { %v1289_v44 = vpop.f32.mrb[12].mxu0 }
 0x6cb   : > { %v1397_v46 = vsel %vm766_vm1, %v1289_v44, 0.0  ;;  %v3057_v47 = vpop.f32.mrb[13].mxu0 }
 0x6cc   : > { %v1398_v48 = vadd.f32 %v1397_v46, %v1396_v45  ;;  %v1292_v49 = vpop.f32.mrb[14].mxu0  ;;  %v1339_v51 = vpop.f32.mrb[20].mxu1 }
 0x6cd   : > { %v1404_v53 = vsel %vm770_vm2, %v1292_v49, 0.0  ;;  %v1399_v54 = vsel %vm766_vm1, %v1339_v51, 0.0  ;;  %v3058_v56 = vpop.f32.mrb[15].mxu0  ;;  %v3063_v57 = vpop.f32.mrb[21].mxu1 }
 0x6ce   : > { %v1405_v58 = vadd.f32 %v1404_v53, %v1403_v52  ;;  %v1400_v59 = vadd.f32 %v1399_v54, %v1398_v48  ;;  %v1342_v60 = vpop.f32.mrb[22].mxu1  ;;  %v3286_v52 = vld [vmem:[%s4235_s10] sm:$0xff]   ;;  %v3287_v53 = vld [vmem:[%s4235_s10 + $0x8] sm:$0xff]   ;;  %v3288_v54 = vld [vmem:[%s4235_s10 + $0x10] sm:$0xff]  }
 0x6cf   : > { %v1406_v13 = vsel %vm770_vm2, %v1342_v60, 0.0  ;;  %v3064_v61 = vpop.f32.mrb[23].mxu1  ;;  %v3289_v56 = vld [vmem:[%s4235_s10 + $0x18] sm:$0xff]   ;;  %v3290_v57 = vld [vmem:[%s4235_s10 + $0x20] sm:$0xff]  }
 0x6d0   : > { %v1407_v62 = vadd.f32 %v1406_v13, %v1405_v58  ;;  %v3291_v58 = vld [vmem:[%s4235_s10 + $0x28] sm:$0xff]   ;;  %v3293_v60 = vld [vmem:[%s4235_s10 + $0x38] sm:$0xff]   ;;  %v2813_v13 = vld [vmem:[%s4234_s9] ss:$0 sm:$0xff] }
 0x6d2   : > { %v1389_v63 = vpop.f32.mrb[16].mxu0 }
 0x6d3   : > { %v1401_v0 = vsel %vm766_vm1, %v1389_v63, 0.0  ;;  %v3069_v1 = vpop.f32.mrb[17].mxu0 }
 0x6d4   : > { %v1402_v3 = vadd.f32 %v1401_v0, %v1400_v59  ;;  %v1392_v4 = vpop.f32.mrb[18].mxu0  ;;  %v3292_v59 = vld [vmem:[%s4235_s10 + $0x30] sm:$0xff]  }
 0x6d5   : > { %v1408_v6 = vsel %vm770_vm2, %v1392_v4, 0.0  ;;  %v3070_v8 = vpop.f32.mrb[19].mxu0 }
 0x6d6   : > { %v1409_v9 = vadd.f32 %v1408_v6, %v1407_v62 }
 0x6d8   : > { %v1410_v7 = vpack.c.bf16 %v1409_v9, %v1402_v3 }
 0x6da   : > { %3076 = vmatmul.mubr.msk.bf16.vlgmr.msra.gmra.mrb[24].mxu1 %vm766_vm1, %v1410_v7 }
 0x6db   : > { %3103 = vmatprep.mubr.msk.bf16.mxu1 %vm3465_vm0, %v3464_v2  ;;  %3088 = vmatpush3.bf16.msra.mxu1 %v3286_v52 }
 0x6dc   : > { %3089 = vmatprep.subr.bf16.mxu1 %v3464_v2 }
 0x6df   : > { %3090 = vmatpush3.bf16.msra.mxu1 %v3287_v53  ;;  %v3294_v53 = vld [vmem:[%s4229_s4 + $0x10] sm:$0xff]  }
 0x6e0   : > { %3091 = vmatprep.subr.bf16.mxu1 %v3464_v2 }
 0x6e3   : > { %3092 = vmatpush3.bf16.msra.mxu1 %v3288_v54  ;;  %v3295_v54 = vld [vmem:[%s4229_s4 + $0x18] sm:$0xff]  }
 0x6e4   : > { %3093 = vmatprep.subr.bf16.mxu1 %v3464_v2 }
 0x6e7   : > { %3094 = vmatpush3.bf16.msra.mxu1 %v3289_v56 }
 0x6e8   : > { %3095 = vmatprep.subr.bf16.mxu1 %v3464_v2 }
 0x6eb   : > { %3096 = vmatpush3.bf16.msra.mxu1 %v3290_v57 }
 0x6ec   : > { %3097 = vmatprep.subr.bf16.mxu1 %v3464_v2 }
 0x6ef   : > { %3098 = vmatpush3.bf16.msra.mxu1 %v3291_v58 }
 0x6f0   : > { %3099 = vmatprep.subr.bf16.mxu1 %v3464_v2 }
 0x6f3   : > { %3100 = vmatpush3.bf16.msra.mxu1 %v3292_v59 }
 0x6f4   : > { %3101 = vmatprep.subr.bf16.mxu1 %v3464_v2 }
 0x6f7   : > { %3102 = vmatpush3.bf16.msra.mxu1 %v3293_v60 }
 0x6f8   : > { %3133 = vmatprep.subr.bf16.mxu1 %v3464_v2 }
 0x7ad   : > { %v1464_v10 = vpop.f32.mrb[24].mxu1 }
 0x7ae   : > { %v1471_v12 = vadd.f32 %v1464_v10, %v3692_v41  ;;  %v3077_v14 = vpop.f32.mrb[25].mxu1 }
 0x7af   : > { %v1467_v15 = vpop.f32.mrb[26].mxu1 }
 0x7b0   : > { %v3888_v16 = vadd.f32 %v2812_v11, %v1471_v12  ;;  %v1472_v17 = vadd.f32 %v1467_v15, %v3694_v43  ;;  %v3078_v18 = vpop.f32.mrb[27].mxu1 }
 0x7b2   : > { %v3891_v19 = vadd.f32 %v2812_v11, %v1472_v17  ;;  %v1482_v20 = vsel %vm766_vm1, %v3888_v16, 0.0 }
 0x7b3   : > { %1483 = vadd.xlane.f32.xlu0 %v1482_v20 }
 0x7b4   : > { %v1485_v21 = vsel %vm770_vm2, %v3891_v19, 0.0 }
 0x7b5   : > { %1486 = vadd.xlane.f32.xlu1 %v1485_v21 }
 0x840   : > { %v1484_v22 = vpop.xlane.xlu0 %1483 }
 0x841   : > { %v1488_v26 = vmul.f32 0.03125, %v1484_v22 }
 0x842   : > { %v1487_v41 = vpop.xlane.xlu1 %1486 }
 0x843   : > { %v1490_v27 = vsub.f32 %v3888_v16, %v1488_v26  ;;  %v1489_v28 = vmul.f32 0.03125, %v1487_v41 }
 0x845   : > { %v1491_v33 = vsub.f32 %v3891_v19, %v1489_v28  ;;  %v1492_v43 = vmul.f32 %v1490_v27, %v1490_v27 }
 0x847   : > { %v1494_v25 = vsel %vm766_vm1, %v1492_v43, 0.0  ;;  %v1493_v29 = vmul.f32 %v1491_v33, %v1491_v33  ;;  %v2825_v43 = vld [vmem:[%s4236_s11] ss:$0 sm:$0xff] }
 0x848   : > { %1495 = vadd.xlane.f32.xlu0 %v1494_v25 }
 0x849   : > { %v1497_v36 = vsel %vm770_vm2, %v1493_v29, 0.0 }
 0x84c   : > { %1498 = vadd.xlane.f32.xlu0 %v1497_v36 }
 0x8d5   : > { %v1496_v34 = vpop.xlane.xlu0 %1495 }
 0x8d6   : > { %v1500_v39 = vmul.f32 0.03125, %v1496_v34 }
 0x8d8   : > { %v1502_v40 = vadd.f32 1e-05, %v1500_v39 }
 0x8d9   : > { %v1499_v42 = vpop.xlane.xlu0 %1498 }
 0x8da   : > { %v1501_v44 = vmul.f32 0.03125, %v1499_v42  ;;  %3346 = vrsqrt.f32 %v1502_v40 }
 0x8dc   : > { %v1503_v45 = vadd.f32 1e-05, %v1501_v44 }
 0x8de   : > { %3348 = vrsqrt.f32 %v1503_v45 }
 0x8e4   : > { %v3347_v46 = vpop.eup %3346 }
 0x8e5   : > { %v1506_v48 = vmul.f32 %v3347_v46, %v1490_v27 }
 0x8e8   : > { %v3349_v47 = vpop.eup %3348 }
 0x8e9   : > { %v1507_v49 = vmul.f32 %v3349_v47, %v1491_v33 }
 0x8eb   : > { %v1508_v51 = vpack.c.bf16 %v1507_v49, %v1506_v48 }
 0x8ed   : > { %3084 = vmatmul.mubr.msk.bf16.vlgmr.msra.gmra.mrb[20].mxu0 %vm766_vm1, %v1508_v51 }
 0x8ee   : > { %3111 = vmatprep.mubr.msk.bf16.mxu0 %vm3465_vm0, %v3464_v2  ;;  %3108 = vmatpush3.bf16.msra.mxu0 %v3294_v53 }
 0x8ef   : > { %3109 = vmatprep.subr.bf16.mxu0 %v3464_v2 }
 0x8f2   : > { %3110 = vmatpush3.bf16.msra.mxu0 %v3295_v54 }
 0x8f3   : > { %3115 = vmatprep.subr.bf16.mxu0 %v3464_v2 }
 0x9c0   : > { %v1569_v61 = vpop.f32.mrb[20].mxu0 }
 0x9c1   : > { %v1570_v62 = vadd.f32 %v2813_v13, %v1569_v61  ;;  %v3085_v63 = vpop.f32.mrb[21].mxu0 }
 0x9c2   : > { %v1572_v0 = vpop.f32.mrb[22].mxu0 }
 0x9c3   : > { %v1578_v1 = vmul.f32 0.044715, %v1570_v62  ;;  %v1573_v3 = vadd.f32 %v2813_v13, %v1572_v0  ;;  %v3086_v4 = vpop.f32.mrb[23].mxu0  ;;  %v1576_v21 = vmul.f32 0.5, %v1570_v62 }
 0x9c5   : > { %v1580_v6 = vmul.f32 %v1578_v1, %v1570_v62  ;;  %v1579_v8 = vmul.f32 0.044715, %v1573_v3  ;;  %v1577_v22 = vmul.f32 0.5, %v1573_v3 }
 0x9c7   : > { %v1582_v9 = vmul.f32 %v1580_v6, %v1570_v62  ;;  %v1581_v7 = vmul.f32 %v1579_v8, %v1573_v3 }
 0x9c9   : > { %v1584_v10 = vadd.f32 %v1582_v9, %v1570_v62  ;;  %v1583_v11 = vmul.f32 %v1581_v7, %v1573_v3 }
 0x9cb   : > { %v1586_v12 = vmul.f32 0.7978846, %v1584_v10  ;;  %v1585_v14 = vadd.f32 %v1583_v11, %v1573_v3  ;;  %v2831_v3 = vld [vmem:[%s4230_s5 + $0x1] ss:$0 sm:$0xff] }
 0x9cd   : > { %3350 = vtanh.f32 %v1586_v12  ;;  %v1587_v15 = vmul.f32 0.7978846, %v1585_v14 }
 0x9cf   : > { %3352 = vtanh.f32 %v1587_v15 }
 0x9d7   : > { %v3351_v17 = vpop.eup %3350 }
 0x9d8   : > { %v1590_v18 = vadd.f32 1.0, %v3351_v17 }
 0x9d9   : > { %v3353_v20 = vpop.eup %3352 }
 0x9da   : > { %v1591_v26 = vadd.f32 1.0, %v3353_v20  ;;  %v1592_v41 = vmul.f32 %v1590_v18, %v1576_v21 }
 0x9dc   : > { %v1593_v27 = vmul.f32 %v1591_v26, %v1577_v22 }
 0x9de   : > { %v1594_v28 = vpack.c.bf16 %v1593_v27, %v1592_v41 }
 0x9e0   : > { %3104 = vmatmul.mubr.bf16.vlgmr.msra.gmra.mrb[28].mxu1 %v1594_v28 }
 0x9e1   : > { %3135 = vmatprep.mubr.msk.bf16.mxu1 %vm3465_vm0, %v3464_v2 }
 0xab3   : > { %v1693_v33 = vpop.f32.mrb[28].mxu1 }
 0xab4   : > { %v1700_v25 = vadd.f32 %v1693_v33, %v3888_v16  ;;  %v3105_v29 = vpop.f32.mrb[29].mxu1 }
 0xab5   : > { %v1696_v36 = vpop.f32.mrb[30].mxu1 }
 0xab6   : > { %v3953_v37 = vadd.f32 %v2825_v43, %v1700_v25  ;;  %v1701_v38 = vadd.f32 %v1696_v36, %v3891_v19  ;;  %v3106_v34 = vpop.f32.mrb[31].mxu1 }
 0xab8   : > { %v3956_v39 = vadd.f32 %v2825_v43, %v1701_v38  ;;  %v1711_v40 = vsel %vm766_vm1, %v3953_v37, 0.0 }
 0xab9   : > { %1712 = vadd.xlane.f32.xlu1 %v1711_v40 }
 0xaba   : > { %v1714_v42 = vsel %vm770_vm2, %v3956_v39, 0.0 }
 0xabb   : > { %1715 = vadd.xlane.f32.xlu0 %v1714_v42 }
 0xb46   : > { %v1713_v44 = vpop.xlane.xlu1 %1712 }
 0xb47   : > { %v1717_v45 = vmul.f32 0.03125, %v1713_v44 }
 0xb48   : > { %v1716_v16 = vpop.xlane.xlu0 %1715 }
 0xb49   : > { %v1719_v46 = vsub.f32 %v3953_v37, %v1717_v45  ;;  %v1718_v47 = vmul.f32 0.03125, %v1716_v16 }
 0xb4b   : > { %v1720_v48 = vsub.f32 %v3956_v39, %v1718_v47  ;;  %v1721_v19 = vmul.f32 %v1719_v46, %v1719_v46 }
 0xb4d   : > { %v1723_v49 = vsel %vm766_vm1, %v1721_v19, 0.0  ;;  %v1722_v51 = vmul.f32 %v1720_v48, %v1720_v48 }
 0xb4e   : > { %1724 = vadd.xlane.f32.xlu1 %v1723_v49 }
 0xb4f   : > { %v1726_v52 = vsel %vm770_vm2, %v1722_v51, 0.0 }
 0xb50   : > { %1727 = vadd.xlane.f32.xlu0 %v1726_v52 }
 0xbdb   : > { %v1725_v56 = vpop.xlane.xlu1 %1724 }
 0xbdc   : > { %v1729_v57 = vmul.f32 0.03125, %v1725_v56 }
 0xbdd   : > { %v1728_v58 = vpop.xlane.xlu0 %1727 }
 0xbde   : > { %v1731_v59 = vadd.f32 1e-05, %v1729_v57  ;;  %v1730_v60 = vmul.f32 0.03125, %v1728_v58 }
 0xbe0   : > { %3354 = vrsqrt.f32 %v1731_v59  ;;  %v1732_v13 = vadd.f32 1e-05, %v1730_v60 }
 0xbe2   : > { %3356 = vrsqrt.f32 %v1732_v13 }
 0xbea   : > { %v3355_v61 = vpop.eup %3354 }
 0xbeb   : > { %v1735_v63 = vmul.f32 %v3355_v61, %v1719_v46 }
 0xbec   : > { %v3357_v62 = vpop.eup %3356 }
 0xbed   : > { %v1736_v0 = vmul.f32 %v3357_v62, %v1720_v48 }
 0xbef   : > { %v1737_v1 = vpack.c.bf16 %v1736_v0, %v1735_v63 }
 0xbf1   : > { %3112 = vmatmul.mubr.msk.bf16.vlgmr.msra.gmra.mrb[24].mxu0 %vm766_vm1, %v1737_v1 }
 0xbf2   : > { %3117 = vmatprep.mubr.msk.bf16.mxu0 %vm3465_vm0, %v3464_v2 }
 0xcc4   : > { %v1800_v4 = vpop.f32.mrb[24].mxu0 }
 0xcc5   : > { %v3113_v6 = vpop.f32.mrb[25].mxu0  ;;  %v1801_v9 = vadd.f32 %v2831_v3, %v1800_v4 }
 0xcc6   : > { %v1803_v8 = vpop.f32.mrb[26].mxu0 }
 0xcc7   : > { %v1804_v7 = vadd.f32 %v2831_v3, %v1803_v8  ;;  %v3114_v10 = vpop.f32.mrb[27].mxu0 }
 0xcc9   : > { %v3980_v11 = vpack.c.bf16 %v1804_v7, %v1801_v9 }
 0xccb   : > { %1813 = vrot.lane.b32.xlu1 %v3980_v11, %s3466_s20  ;;  %v1808_v15 = vmul.bf16 %v3980_v11, %v3729_v23  ;;  %v1811_v17 = vmul.bf16 %v3980_v11, %v3753_v32  ;;  %v1809_v18 = vmul.bf16 %v3980_v11, %v3731_v24  ;;  %v1810_v23 = vmul.bf16 %v3980_v11, %v3751_v31  ;;  %s3469_s20 = smov [#allocation2]  }
 0xccc   : > { %s3404_s24 = sshll.u32 %s3469_s20, 4  ;;  %s3405_s24 = int_to_ptr.vmem [resolvable:$false] %s3404_s24 }
 0xccd   : > { %s3406_s21 = scalar_lea.vmem %s3405_s24, 32 }
 0xd3d   : > { %v1814_v12 = vpop.permute.xlu1 %1813 }
 0xd3e   : > { %v1819_v14 = vsel %vm766_vm1, %v1814_v12, 0 }
 0xd3f   : > { %3116 = vmatpush3.bf16.xpose.msra.mxu0 %v1819_v14  ;;  %3134 = vmatpush3.bf16.xpose.msra.mxu1 %v1819_v14 }
 0xd40   : > { %3121 = vmatprep.subr.bf16.mxu0 %v3464_v2  ;;  %3145 = vmatprep.subr.bf16.mxu1 %v3464_v2 }
 0xd46   : > { %3118 = vmatmul.mubr.msk.bf16.vlgmr.msra.gmra.mrb[28].mxu0 %vm766_vm1, %v1808_v15  ;;  %3136 = vmatmul.mubr.msk.bf16.vlgmr.msra.gmra.mrb[32].mxu1 %vm766_vm1, %v1811_v17 }
 0xd47   : > { %3122 = vmatpush3.bf16.xpose.msra.mxu0 %v1819_v14  ;;  %3123 = vmatprep.mubr.msk.bf16.mxu0 %vm3465_vm0, %v3464_v2 }
 0xd48   : > { %3127 = vmatprep.subr.bf16.mxu0 %v3464_v2  ;;  %3147 = vmatprep.mubr.msk.bf16.mxu1 %vm3465_vm0, %v3464_v2 }
 0xd4e   : > { %3124 = vmatmul.mubr.msk.bf16.vlgmr.msra.gmra.mrb[32].mxu0 %vm766_vm1, %v1809_v18 }
 0xd4f   : > { %3128 = vmatpush3.bf16.xpose.msra.mxu0 %v1819_v14  ;;  %3129 = vmatprep.mubr.msk.bf16.mxu0 %vm3465_vm0, %v3464_v2 }
 0xd50   : > { %3139 = vmatprep.subr.bf16.mxu0 %v3464_v2 }
 0xd56   : > { %3130 = vmatmul.mubr.msk.bf16.vlgmr.msra.gmra.mrb[36].mxu0 %vm766_vm1, %v1810_v23 }
 0xd57   : > { %3141 = vmatprep.mubr.msk.bf16.mxu0 %vm3465_vm0, %v3464_v2 }
 0xe19   : > { %v1855_v32 = vpop.f32.mrb[28].mxu0  ;;  %v1987_v20 = vpop.f32.mrb[32].mxu1 }
 0xe1a   : > { %v3119_v21 = vpop.f32.mrb[29].mxu0  ;;  %v3137_v24 = vpop.f32.mrb[33].mxu1  ;;  %v1994_v22 = vsel %vm1078_vm3, %v1855_v32, -inf  ;;  %v2012_v46 = vsel %vm1078_vm3, %v1987_v20, -inf }
 0xe1b   : > { %1995 = vmax.xlane.f32.xlu0 %v1994_v22  ;;  %v1858_v26 = vpop.f32.mrb[30].mxu0  ;;  %v1990_v41 = vpop.f32.mrb[34].mxu1 }
 0xe1c   : > { %v3120_v27 = vpop.f32.mrb[31].mxu0  ;;  %v3138_v28 = vpop.f32.mrb[35].mxu1  ;;  %v1997_v33 = vsel %vm1082_vm4, %v1858_v26, -inf  ;;  %v2015_v47 = vsel %vm1082_vm4, %v1990_v41, -inf }
 0xe1f   : > { %1998 = vmax.xlane.f32.xlu0 %v1997_v33  ;;  %v2083_v33 = vmul.bf16 %v3980_v11, %v3809_v30 }
 0xe21   : > { %v1899_v31 = vpop.f32.mrb[32].mxu0 }
 0xe22   : > { %v3125_v43 = vpop.f32.mrb[33].mxu0  ;;  %v2000_v25 = vsel %vm1078_vm3, %v1899_v31, -inf }
 0xe23   : > { %2001 = vmax.xlane.f32.xlu0 %v2000_v25  ;;  %v1902_v29 = vpop.f32.mrb[34].mxu0  ;;  %v2085_v43 = vmul.bf16 %v3980_v11, %v3828_v50  ;;  %v2082_v25 = vmul.bf16 %v3980_v11, %v3789_v5 }
 0xe24   : > { %v3126_v36 = vpop.f32.mrb[35].mxu0  ;;  %v2003_v38 = vsel %vm1082_vm4, %v1902_v29, -inf }
 0xe27   : > { %2004 = vmax.xlane.f32.xlu0 %v2003_v38 }
 0xe29   : > { %v1943_v34 = vpop.f32.mrb[36].mxu0 }
 0xe2a   : > { %v3131_v40 = vpop.f32.mrb[37].mxu0  ;;  %v2006_v42 = vsel %vm1078_vm3, %v1943_v34, -inf }
 0xe2b   : > { %2007 = vmax.xlane.f32.xlu0 %v2006_v42  ;;  %v1946_v44 = vpop.f32.mrb[38].mxu0 }
 0xe2c   : > { %v3132_v45 = vpop.f32.mrb[39].mxu0  ;;  %v2009_v16 = vsel %vm1082_vm4, %v1946_v44, -inf }
 0xe2d   : > { %2010 = vmax.xlane.f32.xlu1 %v2009_v16 }
 0xe2f   : > { %2013 = vmax.xlane.f32.xlu0 %v2012_v46 }
 0xe33   : > { %2016 = vmax.xlane.f32.xlu0 %v2015_v47 }
 0xea8   : > { %v1996_v48 = vpop.xlane.xlu0 %1995 }
 0xea9   : > { %v2018_v19 = vsub.f32 %v1855_v32, %v1996_v48 }
 0xeab   : > { %v2026_v49 = vmul.f32 1.442695, %v2018_v19 }
 0xeac   : > { %v1999_v51 = vpop.xlane.xlu0 %1998 }
 0xead   : > { %3358 = vpow2.f32 %v2026_v49  ;;  %v2019_v58 = vsub.f32 %v1858_v26, %v1999_v51 }
 0xeaf   : > { %v2028_v13 = vmul.f32 1.442695, %v2019_v58 }
 0xeb0   : > { %v2002_v52 = vpop.xlane.xlu0 %2001 }
 0xeb1   : > { %v2020_v61 = vsub.f32 %v1899_v31, %v2002_v52  ;;  %v2084_v31 = vmul.bf16 %v3980_v11, %v3815_v35 }
 0xeb3   : > { %v2030_v1 = vmul.f32 1.442695, %v2020_v61 }
 0xeb4   : > { %v2005_v53 = vpop.xlane.xlu0 %2004 }
 0xeb5   : > { %v2021_v3 = vsub.f32 %v1902_v29, %v2005_v53 }
 0xeb7   : > { %v4017_v54 = vpop.eup %3358  ;;  %v2032_v6 = vmul.f32 1.442695, %v2021_v3 }
 0xeb8   : > { %v2008_v56 = vpop.xlane.xlu0 %2007  ;;  %v2042_v57 = vsel %vm1078_vm3, %v4017_v54, 0.0 }
 0xeb9   : > { %2043 = vadd.xlane.f32.xlu0 %v2042_v57  ;;  %v2022_v8 = vsub.f32 %v1943_v34, %v2008_v56 }
 0xeba   : > { %v2011_v9 = vpop.xlane.xlu1 %2010 }
 0xebb   : > { %v2034_v10 = vmul.f32 1.442695, %v2022_v8  ;;  %v2023_v12 = vsub.f32 %v1946_v44, %v2011_v9 }
 0xebc   : > { %v2014_v59 = vpop.xlane.xlu0 %2013 }
 0xebd   : > { %v2024_v60 = vsub.f32 %v1987_v20, %v2014_v59  ;;  %v2036_v18 = vmul.f32 1.442695, %v2023_v12 }
 0xebf   : > { %v2038_v62 = vmul.f32 1.442695, %v2024_v60 }
 0xec0   : > { %v2017_v63 = vpop.xlane.xlu0 %2016 }
 0xec1   : > { %3360 = vpow2.f32 %v2038_v62  ;;  %v2025_v0 = vsub.f32 %v1990_v41, %v2017_v63 }
 0xec2   : > { %3362 = vpow2.f32 %v2028_v13 }
 0xec3   : > { %v2040_v4 = vmul.f32 1.442695, %v2025_v0 }
 0xec5   : > { %3364 = vpow2.f32 %v2040_v4  ;;  %v3296_v4 = vld [vmem:[%s4231_s6 + $0x10] sm:$0xff]  }
 0xec6   : > { %3366 = vpow2.f32 %v2030_v1 }
 0xec7   : > { %3368 = vpow2.f32 %v2032_v6  ;;  %v3297_v6 = vld [vmem:[%s4231_s6 + $0x18] sm:$0xff]  }
 0xec8   : > { %3370 = vpow2.f32 %v2034_v10 }
 0xec9   : > { %3372 = vpow2.f32 %v2036_v18 }
 0xecb   : > { %v4021_v7 = vpop.eup %3360 }
 0xecc   : > { %v2060_v14 = vsel %vm1078_vm3, %v4021_v7, 0.0  ;;  %v3363_v15 = vpop.eup %3362 }
 0xecd   : > { %2061 = vadd.xlane.f32.xlu0 %v2060_v14  ;;  %v2045_v23 = vsel %vm1082_vm4, %v3363_v15, 0.0 }
 0xecf   : > { %v4025_v17 = vpop.eup %3364 }
 0xed0   : > { %v2063_v32 = vsel %vm1082_vm4, %v4025_v17, 0.0  ;;  %v3367_v20 = vpop.eup %3366 }
 0xed1   : > { %2046 = vadd.xlane.f32.xlu0 %v2045_v23  ;;  %2064 = vadd.xlane.f32.xlu1 %v2063_v32  ;;  %v2048_v21 = vsel %vm1078_vm3, %v3367_v20, 0.0  ;;  %v3369_v24 = vpop.eup %3368 }
 0xed2   : > { %v2051_v22 = vsel %vm1082_vm4, %v3369_v24, 0.0  ;;  %v4032_v26 = vpop.eup %3370 }
 0xed3   : > { %v2054_v41 = vsel %vm1078_vm3, %v4032_v26, 0.0  ;;  %v4036_v27 = vpop.eup %3372 }
 0xed4   : > { %v2057_v28 = vsel %vm1082_vm4, %v4036_v27, 0.0 }
 0xed5   : > { %2049 = vadd.xlane.f32.xlu0 %v2048_v21 }
 0xed9   : > { %2052 = vadd.xlane.f32.xlu0 %v2051_v22 }
 0xedd   : > { %2055 = vadd.xlane.f32.xlu0 %v2054_v41 }
 0xee1   : > { %2058 = vadd.xlane.f32.xlu0 %v2057_v28 }
 0xee2   : > { %2141 = vrot.lane.b32.xlu1 %v2083_v33, %s3467_s25 }
 0xee6   : > { %2191 = vrot.lane.b32.xlu1 %v2084_v31, %s3467_s25 }
 0xeea   : > { %2241 = vrot.lane.b32.xlu1 %v2085_v43, %s3467_s25 }
 0xef7   : > { %2091 = vrot.lane.b32.xlu0 %v2082_v25, %s3467_s25  ;;  %s458_s25 = sand.u32 1, %s3454_s30  }
 0xef8   : > { %s459_s27 = scalar_lea.vmem [#allocation2], %s458_s25  ;;  %s2698_s17 = scalar_lea.sflag [#allocation3], %s458_s25 }
 0xef9   : > { %s2710_s26 = sshll.u32 %s459_s27, 4  ;;  %s4185_s26 = int_to_ptr.vmem [resolvable:$true] %s2710_s26 }
 0xefa   : > { %s3400_s22 = scalar_lea.vmem %s4185_s26, 16  ;;  %p3407_p0 = scmp.lt.s32.totalorder %s4185_s26, %s3405_s24 }
 0xefb   : > { %p3401_p11 = scmp.ne.s32.totalorder %s4185_s26, %s3400_s22  ;;  %p3408_p1 = scmp.lt.s32.totalorder %s3406_s21, %s3400_s22 }
 0xefd   : > { %p3402_p12 = pnand %p3401_p11, %p3583_p5  ;;  %p3409_p2 = por %p3408_p1, %p3407_p0 }
 0xeff   : > { %p3403_p13 = pneg %p3402_p12 }
 0xf01   : > { %p3410_p3 = pnand %p3409_p2, %p3403_p13 }
 0xf46   : > { %v2044_v29 = vpop.xlane.xlu0 %2043 }
 0xf5a   : > { %v2062_v30 = vpop.xlane.xlu0 %2061 }
 0xf5e   : > { %v2065_v36 = vpop.xlane.xlu1 %2064  ;;  %v2047_v38 = vpop.xlane.xlu0 %2046 }
 0xf5f   : > { %3374 = vrcp.f32 %v2047_v38 }
 0xf62   : > { %v2142_v34 = vpop.permute.xlu1 %2141  ;;  %v2050_v40 = vpop.xlane.xlu0 %2049 }
 0xf63   : > { %v2147_v35 = vand.u32 %v2142_v34, %v3837_v55  ;;  %3376 = vrcp.f32 %v2050_v40 }
 0xf64   : > { %3378 = vrcp.f32 %v2044_v29 }
 0xf65   : > { %3146 = vmatpush3.bf16.msra.mxu1 %v2147_v35 }
 0xf66   : > { %v2053_v50 = vpop.xlane.xlu0 %2052  ;;  %3157 = vmatprep.subr.bf16.mxu1 %v3464_v2  ;;  %v2192_v5 = vpop.permute.xlu1 %2191 }
 0xf67   : > { %3380 = vrcp.f32 %v2053_v50  ;;  %v2197_v13 = vand.u32 %v2192_v5, %v3837_v55  ;;  %v2851_v5 = vld [vmem:[%s4232_s7 + $0x1] ss:$0 sm:$0xff] }
 0xf68   : > { %3382 = vrcp.f32 %v2065_v36 }
 0xf69   : > { %3384 = vrcp.f32 %v2062_v30  ;;  %v3375_v11 = vpop.eup %3374 }
 0xf6a   : > { %v2056_v42 = vpop.xlane.xlu0 %2055  ;;  %v2075_v47 = vmul.f32 %v3375_v11, %v3363_v15  ;;  %v2242_v49 = vpop.permute.xlu1 %2241 }
 0xf6b   : > { %3386 = vrcp.f32 %v2056_v42  ;;  %v2247_v58 = vand.u32 %v2242_v49, %v3837_v55 }
 0xf6d   : > { %v3377_v45 = vpop.eup %3376 }
 0xf6e   : > { %v2059_v44 = vpop.xlane.xlu0 %2058  ;;  %v3379_v16 = vpop.eup %3378  ;;  %v2076_v48 = vmul.f32 %v3377_v45, %v3367_v20 }
 0xf6f   : > { %3388 = vrcp.f32 %v2059_v44  ;;  %v2074_v53 = vmul.f32 %v3379_v16, %v4017_v54 }
 0xf71   : > { %v3381_v46 = vpop.eup %3380  ;;  %v2086_v59 = vpack.c.bf16 %v2075_v47, %v2074_v53 }
 0xf72   : > { %v2077_v19 = vmul.f32 %v3381_v46, %v3369_v24  ;;  %v2092_v51 = vpop.permute.xlu0 %2091  ;;  %v3383_v57 = vpop.eup %3382 }
 0xf73   : > { %v2097_v52 = vand.u32 %v2092_v51, %v3837_v55  ;;  %v3385_v60 = vpop.eup %3384  ;;  %v2081_v54 = vmul.f32 %v3383_v57, %v4025_v17 }
 0xf74   : > { %v2087_v56 = vpack.c.bf16 %v2077_v19, %v2076_v48  ;;  %v2080_v63 = vmul.f32 %v3385_v60, %v4021_v7 }
 0xf75   : > { %3140 = vmatpush3.bf16.msra.mxu0 %v2097_v52  ;;  %v3387_v61 = vpop.eup %3386 }
 0xf76   : > { %3148 = vmatmul.mubr.msk.bf16.vlgmr.msra.gmra.mrb[36].mxu1 %vm1078_vm3, %v2087_v56  ;;  %3151 = vmatprep.subr.bf16.mxu0 %v3464_v2  ;;  %v2078_v0 = vmul.f32 %v3387_v61, %v4032_v26  ;;  %v2089_v1 = vpack.c.bf16 %v2081_v54, %v2080_v63  ;;  %v3299_v61 = vld [vmem:[%s4233_s8 + $0x18] sm:$0xff]  }
 0xf77   : > { %3158 = vmatpush3.bf16.msra.mxu1 %v2247_v58  ;;  %3159 = vmatprep.mubr.msk.bf16.mxu1 %vm3465_vm0, %v3464_v2 }
 0xf78   : > { %3142 = vmatmul.mubr.msk.bf16.vlgmr.msra.gmra.mrb[40].mxu0 %vm1078_vm3, %v2086_v59  ;;  %3171 = vmatprep.subr.bf16.mxu1 %v3464_v2 }
 0xf79   : > { %v3389_v62 = vpop.eup %3388  ;;  %3152 = vmatpush3.bf16.msra.mxu0 %v2197_v13  ;;  %3153 = vmatprep.mubr.msk.bf16.mxu0 %vm3465_vm0, %v3464_v2  ;;  %v3298_v13 = vld [vmem:[%s4233_s8 + $0x10] sm:$0xff]  }
 0xf7a   : > { %v2079_v55 = vmul.f32 %v3389_v62, %v4036_v27  ;;  %3163 = vmatprep.subr.bf16.mxu0 %v3464_v2 }
 0xf7c   : > { %v2088_v3 = vpack.c.bf16 %v2079_v55, %v2078_v0 }
 0xf7e   : > { %3160 = vmatmul.mubr.msk.bf16.vlgmr.msra.gmra.mrb[40].mxu1 %vm1078_vm3, %v2089_v1 }
 0xf7f   : > { %3175 = vmatprep.mubr.msk.bf16.mxu1 %vm3465_vm0, %v3464_v2  ;;  %3172 = vmatpush3.bf16.msra.mxu1 %v3298_v13 }
 0xf80   : > { %3154 = vmatmul.mubr.msk.bf16.vlgmr.msra.gmra.mrb[44].mxu0 %vm1078_vm3, %v2088_v3  ;;  %3173 = vmatprep.subr.bf16.mxu1 %v3464_v2 }
 0xf81   : > { %3167 = vmatprep.mubr.msk.bf16.mxu0 %vm3465_vm0, %v3464_v2  ;;  %3164 = vmatpush3.bf16.msra.mxu0 %v3296_v4 }
 0xf82   : > { %3165 = vmatprep.subr.bf16.mxu0 %v3464_v2 }
 0xf83   : > { %3174 = vmatpush3.bf16.msra.mxu1 %v3299_v61 }
 0xf84   : > { %3199 = vmatprep.subr.bf16.mxu1 %v3464_v2 }
 0xf85   : > { %3166 = vmatpush3.bf16.msra.mxu0 %v3297_v6 }
 0xf86   : > { %3179 = vmatprep.subr.bf16.mxu0 %v3464_v2 }
0x1049   : > { %v2183_v8 = vpop.f32.mrb[36].mxu1 }
0x104a   : > { %v3149_v9 = vpop.f32.mrb[37].mxu1  ;;  %v2291_v12 = vsel %vm766_vm1, %v2183_v8, 0.0 }
0x104b   : > { %v2133_v7 = vpop.f32.mrb[40].mxu0  ;;  %v2186_v10 = vpop.f32.mrb[38].mxu1 }
0x104c   : > { %v2290_v14 = vsel %vm766_vm1, %v2133_v7, 0.0  ;;  %v3143_v15 = vpop.f32.mrb[41].mxu0  ;;  %v3150_v17 = vpop.f32.mrb[39].mxu1  ;;  %v2298_v32 = vsel %vm770_vm2, %v2186_v10, 0.0  ;;  %v3300_v7 = vld [vmem:[%s4235_s10 + $0x40] sm:$0xff]   ;;  %v3301_v10 = vld [vmem:[%s4235_s10 + $0x48] sm:$0xff]  }
0x104d   : > { %v2292_v18 = vadd.f32 %v2291_v12, %v2290_v14  ;;  %v2136_v23 = vpop.f32.mrb[42].mxu0  ;;  %v3302_v12 = vld [vmem:[%s4235_s10 + $0x50] sm:$0xff]   ;;  %v3303_v14 = vld [vmem:[%s4235_s10 + $0x58] sm:$0xff]   ;;  %v3304_v15 = vld [vmem:[%s4235_s10 + $0x60] sm:$0xff]  }
0x104e   : > { %v2297_v20 = vsel %vm770_vm2, %v2136_v23, 0.0  ;;  %v3144_v21 = vpop.f32.mrb[43].mxu0  ;;  %v3305_v17 = vld [vmem:[%s4235_s10 + $0x68] sm:$0xff]   ;;  %v3307_v23 = vld [vmem:[%s4235_s10 + $0x78] sm:$0xff]  }
0x104f   : > { %v2299_v24 = vadd.f32 %v2298_v32, %v2297_v20  ;;  %v2857_v32 = vld [vmem:[%s4234_s9 + $0x1] ss:$0 sm:$0xff] }
0x1051   : > { %v2283_v22 = vpop.f32.mrb[40].mxu1 }
0x1052   : > { %v3161_v26 = vpop.f32.mrb[41].mxu1  ;;  %v2295_v29 = vsel %vm766_vm1, %v2283_v22, 0.0 }
0x1053   : > { %v2233_v41 = vpop.f32.mrb[44].mxu0  ;;  %v2286_v27 = vpop.f32.mrb[42].mxu1 }
0x1054   : > { %v2293_v28 = vsel %vm766_vm1, %v2233_v41, 0.0  ;;  %v3155_v33 = vpop.f32.mrb[45].mxu0  ;;  %v3162_v31 = vpop.f32.mrb[43].mxu1  ;;  %v2302_v40 = vsel %vm770_vm2, %v2286_v27, 0.0 }
0x1055   : > { %v2294_v43 = vadd.f32 %v2293_v28, %v2292_v18  ;;  %v2236_v25 = vpop.f32.mrb[46].mxu0  ;;  %v3306_v18 = vld [vmem:[%s4235_s10 + $0x70] sm:$0xff]  }
0x1056   : > { %v2300_v30 = vsel %vm770_vm2, %v2236_v25, 0.0  ;;  %v3156_v36 = vpop.f32.mrb[47].mxu0 }
0x1057   : > { %v2296_v38 = vadd.f32 %v2295_v29, %v2294_v43  ;;  %v2301_v34 = vadd.f32 %v2300_v30, %v2299_v24 }
0x1059   : > { %v2303_v35 = vadd.f32 %v2302_v40, %v2301_v34 }
0x105b   : > { %v2304_v50 = vpack.c.bf16 %v2303_v35, %v2296_v38 }
0x105d   : > { %3168 = vmatmul.mubr.msk.bf16.vlgmr.msra.gmra.mrb[48].mxu0 %vm766_vm1, %v2304_v50 }
0x105e   : > { %3195 = vmatprep.mubr.msk.bf16.mxu0 %vm3465_vm0, %v3464_v2  ;;  %3180 = vmatpush3.bf16.msra.mxu0 %v3300_v7 }
0x105f   : > { %3181 = vmatprep.subr.bf16.mxu0 %v3464_v2 }
0x1062   : > { %3182 = vmatpush3.bf16.msra.mxu0 %v3301_v10 }
0x1063   : > { %3183 = vmatprep.subr.bf16.mxu0 %v3464_v2 }
0x1066   : > { %3184 = vmatpush3.bf16.msra.mxu0 %v3302_v12 }
0x1067   : > { %3185 = vmatprep.subr.bf16.mxu0 %v3464_v2 }
0x106a   : > { %3186 = vmatpush3.bf16.msra.mxu0 %v3303_v14 }
0x106b   : > { %3187 = vmatprep.subr.bf16.mxu0 %v3464_v2 }
0x106e   : > { %3188 = vmatpush3.bf16.msra.mxu0 %v3304_v15  ;;  %v2639_v15 = vld [vmem:[%s4238_s13] sm:$0x1] }
0x106f   : > { %3189 = vmatprep.subr.bf16.mxu0 %v3464_v2 }
0x1072   : > { %3190 = vmatpush3.bf16.msra.mxu0 %v3305_v17 }
0x1073   : > { %3191 = vmatprep.subr.bf16.mxu0 %v3464_v2 }
0x1076   : > { %3192 = vmatpush3.bf16.msra.mxu0 %v3306_v18 }
0x1077   : > { %3193 = vmatprep.subr.bf16.mxu0 %v3464_v2 }
0x107a   : > { %3194 = vmatpush3.bf16.msra.mxu0 %v3307_v23 }
0x1130   : > { %v2359_v42 = vpop.f32.mrb[48].mxu0 }
0x1131   : > { %v2366_v11 = vadd.f32 %v2359_v42, %v3953_v37  ;;  %v3169_v44 = vpop.f32.mrb[49].mxu0 }
0x1132   : > { %v2362_v45 = vpop.f32.mrb[50].mxu0 }
0x1133   : > { %v4100_v16 = vadd.f32 %v2851_v5, %v2366_v11  ;;  %v2367_v46 = vadd.f32 %v2362_v45, %v3956_v39  ;;  %v3170_v47 = vpop.f32.mrb[51].mxu0 }
0x1134   : > { %v2886_v47 = vld [vmem:[%s4236_s11 + $0x1] ss:$0 sm:$0xff] }
0x1135   : > { %v4103_v48 = vadd.f32 %v2851_v5, %v2367_v46  ;;  %v2378_v19 = vsel %vm766_vm1, %v4100_v16, 0.0 }
0x1136   : > { %2379 = vadd.xlane.f32.xlu0 %v2378_v19 }
0x1137   : > { %v2381_v49 = vsel %vm770_vm2, %v4103_v48, 0.0 }
0x1138   : > { %2382 = vadd.xlane.f32.xlu1 %v2381_v49 }
0x11c3   : > { %v2380_v51 = vpop.xlane.xlu0 %2379 }
0x11c4   : > { %v2384_v52 = vmul.f32 0.03125, %v2380_v51 }
0x11c5   : > { %v2383_v37 = vpop.xlane.xlu1 %2382 }
0x11c6   : > { %v2386_v53 = vsub.f32 %v4100_v16, %v2384_v52  ;;  %v2385_v56 = vmul.f32 0.03125, %v2383_v37 }
0x11c8   : > { %v2387_v57 = vsub.f32 %v4103_v48, %v2385_v56  ;;  %v2388_v39 = vmul.f32 %v2386_v53, %v2386_v53 }
0x11ca   : > { %v2390_v58 = vsel %vm766_vm1, %v2388_v39, 0.0  ;;  %v2389_v59 = vmul.f32 %v2387_v57, %v2387_v57 }
0x11cb   : > { %2391 = vadd.xlane.f32.xlu0 %v2390_v58 }
0x11cc   : > { %v2393_v60 = vsel %vm770_vm2, %v2389_v59, 0.0 }
0x11cf   : > { %2394 = vadd.xlane.f32.xlu0 %v2393_v60 }
0x1258   : > { %v2392_v54 = vpop.xlane.xlu0 %2391 }
0x1259   : > { %v2396_v62 = vmul.f32 0.03125, %v2392_v54 }
0x125b   : > { %v2398_v63 = vadd.f32 1e-05, %v2396_v62 }
0x125c   : > { %v2395_v55 = vpop.xlane.xlu0 %2394 }
0x125d   : > { %v2397_v0 = vmul.f32 0.03125, %v2395_v55  ;;  %3390 = vrsqrt.f32 %v2398_v63 }
0x125f   : > { %v2399_v1 = vadd.f32 1e-05, %v2397_v0 }
0x1261   : > { %3392 = vrsqrt.f32 %v2399_v1 }
0x1267   : > { %v3391_v3 = vpop.eup %3390 }
0x1268   : > { %v2402_v6 = vmul.f32 %v3391_v3, %v2386_v53 }
0x126b   : > { %v3393_v4 = vpop.eup %3392 }
0x126c   : > { %v2403_v8 = vmul.f32 %v3393_v4, %v2387_v57  ;;  %v3308_v4 = vld [vmem:[%s4237_s12] sm:$0xff]  }
0x126e   : > { %v2404_v9 = vpack.c.bf16 %v2403_v8, %v2402_v6  ;;  %v3309_v6 = vld [vmem:[%s4237_s12 + $0x8] sm:$0xff]  }
0x1270   : > { %3176 = vmatmul.mubr.msk.bf16.vlgmr.msra.gmra.mrb[44].mxu1 %vm766_vm1, %v2404_v9 }
0x1271   : > { %3203 = vmatprep.mubr.msk.bf16.mxu1 %vm3465_vm0, %v3464_v2  ;;  %3200 = vmatpush3.bf16.msra.mxu1 %v3308_v4 }
0x1272   : > { %3201 = vmatprep.subr.bf16.mxu1 %v3464_v2 }
0x1275   : > { %3202 = vmatpush3.bf16.msra.mxu1 %v3309_v6 }
0x1343   : > { %v2467_v20 = vpop.f32.mrb[44].mxu1 }
0x1344   : > { %v2468_v21 = vadd.f32 %v2857_v32, %v2467_v20  ;;  %v3177_v24 = vpop.f32.mrb[45].mxu1 }
0x1345   : > { %v2470_v22 = vpop.f32.mrb[46].mxu1 }
0x1346   : > { %v2476_v26 = vmul.f32 0.044715, %v2468_v21  ;;  %v2471_v41 = vadd.f32 %v2857_v32, %v2470_v22  ;;  %v3178_v27 = vpop.f32.mrb[47].mxu1  ;;  %v2474_v50 = vmul.f32 0.5, %v2468_v21 }
0x1348   : > { %v2478_v28 = vmul.f32 %v2476_v26, %v2468_v21  ;;  %v2477_v33 = vmul.f32 0.044715, %v2471_v41  ;;  %v2475_v42 = vmul.f32 0.5, %v2471_v41 }
0x134a   : > { %v2480_v31 = vmul.f32 %v2478_v28, %v2468_v21  ;;  %v2479_v43 = vmul.f32 %v2477_v33, %v2471_v41 }
0x134c   : > { %v2482_v25 = vadd.f32 %v2480_v31, %v2468_v21  ;;  %v2481_v29 = vmul.f32 %v2479_v43, %v2471_v41 }
0x134e   : > { %v2484_v30 = vmul.f32 0.7978846, %v2482_v25  ;;  %v2483_v36 = vadd.f32 %v2481_v29, %v2471_v41 }
0x1350   : > { %3394 = vtanh.f32 %v2484_v30  ;;  %v2485_v38 = vmul.f32 0.7978846, %v2483_v36 }
0x1352   : > { %3396 = vtanh.f32 %v2485_v38 }
0x135a   : > { %v3395_v34 = vpop.eup %3394 }
0x135b   : > { %v2488_v40 = vadd.f32 1.0, %v3395_v34 }
0x135c   : > { %v3397_v35 = vpop.eup %3396 }
0x135d   : > { %v2489_v5 = vadd.f32 1.0, %v3397_v35  ;;  %v2490_v11 = vmul.f32 %v2488_v40, %v2474_v50 }
0x135f   : > { %v2491_v44 = vmul.f32 %v2489_v5, %v2475_v42 }
0x1361   : > { %v2492_v45 = vpack.c.bf16 %v2491_v44, %v2490_v11 }
0x1363   : > { %3196 = vmatmul.mubr.bf16.vlgmr.msra.gmra.mrb[52].mxu0 %v2492_v45 }
0x1436   : > { %v2592_v46 = vpop.f32.mrb[52].mxu0 }
0x1437   : > { %v2599_v19 = vadd.f32 %v2592_v46, %v4100_v16  ;;  %v3197_v49 = vpop.f32.mrb[53].mxu0 }
0x1438   : > { %v2595_v51 = vpop.f32.mrb[54].mxu0 }
0x1439   : > { %v2609_v52 = vadd.f32 %v2886_v47, %v2599_v19  ;;  %v2600_v37 = vadd.f32 %v2595_v51, %v4103_v48  ;;  %v3198_v53 = vpop.f32.mrb[55].mxu0 }
0x143b   : > { %v2610_v56 = vadd.f32 %v2886_v47, %v2600_v37  ;;  %v2611_v57 = vsel %vm766_vm1, %v2609_v52, 0.0 }
0x143d   : > { %v2612_v39 = vsel %vm770_vm2, %v2610_v56, 0.0 }
0x143e   : > { %v2613_v58 = vadd.f32 %v2612_v39, %v2611_v57 }
0x1440   : > { %v2614_v59 = vrot.slane %v2613_v58, 4 }
0x1442   : > { %v2615_v60 = vadd.f32 %v2614_v59, %v2613_v58 }
0x1444   : > { %v2616_v13 = vrot.slane %v2615_v60, 2 }
0x1446   : > { %v2617_v61 = vadd.f32 %v2616_v13, %v2615_v60 }
0x1448   : > { %v2618_v54 = vrot.slane %v2617_v61, 1 }
0x144a   : > { %v2619_v62 = vadd.f32 %v2618_v54, %v2617_v61 }
0x144c   : > { %v2620_v63 = vmul.f32 0.11111111, %v2619_v62 }
0x144e   : > { %v2621_v16 = vsel %vm766_vm1, %v2620_v63, 0.0 }
0x144f   : > { %2622 = vadd.xlane.f32.xlu0 %v2621_v16 }
0x14dc   : > { %v2623_v55 = vpop.xlane.xlu0 %2622 }
0x14dd   : > { %v2624_v0 = vmul.f32 0.03125, %v2623_v55 }
0x14df   : > { %v2625_v48 = vsub.f32 %v2620_v63, %v2624_v0 }
0x14e1   : > { %v2626_v1 = vmul.f32 %v2625_v48, %v2625_v48 }
0x14e3   : > { %v2627_v3 = vsel %vm766_vm1, %v2626_v1, 0.0 }
0x14e4   : > { %2628 = vadd.xlane.f32.xlu1 %v2627_v3 }
0x1571   : > { %v2629_v8 = vpop.xlane.xlu1 %2628 }
0x1572   : > { %v2630_v9 = vmul.f32 0.03125, %v2629_v8 }
0x1574   : > { %v2631_v7 = vadd.f32 1e-05, %v2630_v9 }
0x1576   : > { %3398 = vrsqrt.f32 %v2631_v7 }
0x1580   : > { %v3399_v10 = vpop.eup %3398 }
0x1581   : > { %v2633_v12 = vmul.f32 %v3399_v10, %v2625_v48 }
0x1583   : > { %v2634_v14 = vpack.c.bf16 %v2633_v12, %v2633_v12 }
0x1585   : > { %3204 = vmatmul.mubr.msk.bf16.vlgmr.msra.gmra.mrb[48].mxu1 %vm766_vm1, %v2634_v14 }
0x1658   : > { %v2689_v2 = vpop.f32.mrb[48].mxu1 }
0x1659   : > { %v2690_v17 = vadd.f32 %v2689_v2, %v2639_v15  ;;  %v3205_v18 = vpop.f32.mrb[49].mxu1 }
0x165a   : > { %v2692_v23 = vpop.f32.mrb[50].mxu1 }
0x165b   : > { %v3206_v32 = vpop.f32.mrb[51].mxu1  ;;  %2696 = vst.msk [vmem:[%s459_s27] sm:$0x1] %vm2695_vm7, %v2690_v17 }
0x165c   : > { %3413 = shalt.err (!%p3410_p3)
}
0x165d   : > { %s3414_s25 = scalar_lea.hbm %s4183_s18, 16  ;;  %s3418_s15 = scalar_lea.hbm %s4239_s14, 32 }
0x165e   : > { %p3415_p4 = scmp.ne.s32.totalorder %s4183_s18, %s3414_s25  ;;  %p3419_p9 = scmp.lt.u32.totalorder %s4183_s18, %s4239_s14 }
0x165f   : > { %p3420_p10 = scmp.lt.u32.totalorder %s3418_s15, %s3414_s25  ;;  %p3422_p12 = scmp.lt.u32.totalorder %s3414_s25, %s4183_s18 }
0x1660   : > { %p3416_p7 = pnand %p3415_p4, %p3583_p5 }
0x1661   : > { %p3421_p11 = por %p3420_p10, %p3419_p9 }
0x1662   : > { %p3417_p8 = pneg %p3416_p7 }
0x1663   : > { %p3423_p13 = por %p3422_p12, %p3421_p11 }
0x1665   : > { %p3424_p0 = pnand %p3423_p13, %p3417_p8 }
0x1667   : > { %3427 = shalt.err (!%p3424_p0)
}
0x1668   : > { %3208 = dma.vmem_to_hbm [thread:$0]  (%p3583_p5), %s4185_s26, 16, %s4183_s18, %s2698_s17  }
0x1669 PF: > { %p3214_p1 = scmp.ge.s32.totalorder %s3462_s16, 2  ;;  %s2722_s24 = sand.u32 1, %s3450_s29  }
0x166a   : > { %s2723_s21 = scalar_lea.sflag [#allocation3], %s2722_s24 }
0x166b   : > { %p3211_p2 = pnand %p3214_p1, %p3587_p6 }
0x166d   : > { %3445 = dma.done.wait (!%p3211_p2), %s2723_s21, 16  }
0x166e   : > { %3447 = vsyncadd (!%p3211_p2), %s2723_s21, 4294967280  ;;  %s4251_s16 = sld [smem:[#allocation6_spill]]  ;;  %s4252_s25 = sld [smem:[#allocation5_spill]] }
0x166f   : > { %s4253_s15 = sld [smem:[#allocation7_spill]]  ;;  %s4254_s29 = smov %s3454_s30 }
0x1674   : > { %p24_p3 = scmp.ge.s32.totalorder %s4251_s16, 4   ;;  %s4255_s30 = smov %s4252_s25 }
0x1676   :  { %26 = sbr.rel (!%p24_p3) target bundleno = 3 (0x3), region = 119 }
0x167d   :  { %2727 = vsyncpa [#allocation3], 1 }
0x167e   :  { %2729 = vsyncpa [#allocation3 + $0x1], 1 }

</bundles_post_ra>
